<compile_context>
chip_gen: v7x
topology: tpu7x:2x2x1
jax: 0.10.0
libtpu: 0.0.40
codegen_flags: <defaults>
</compile_context>

<pallas_src>
import functools

import jax
import jax.numpy as jnp
from jax import lax
from jax.experimental import pallas as pl
from jax.experimental.pallas import tpu as pltpu


def _layer_norm(v, w, b, eps=1e-5):
    # v is f32; statistics in f32 regardless of parameter dtype.
    mu = jnp.mean(v, axis=-1, keepdims=True)
    var = jnp.mean((v - mu) ** 2, axis=-1, keepdims=True)
    return (v - mu) * lax.rsqrt(var + eps) * w.astype(jnp.float32) + b.astype(jnp.float32)


def transformer_block_kernel(
    x_ref,
    ln1_w_ref, ln1_b_ref,
    wqkv_ref, bqkv_ref, wo_ref, bo_ref,
    ln2_w_ref, ln2_b_ref,
    w1_ref, b1_ref, w2_ref, b2_ref,
    o_ref,
    h2_s, acc_s, k_s, v_s,
    *, heads_count, kv_tile, approx_gelu,
):
    j = pl.program_id(1)          # ff-chunk index (reduction axis)
    n_ff = pl.num_programs(1)
    mm_dtype = w1_ref.dtype       # MXU operand dtype (bf16 when weights are bf16)

    # ---- first ff step: attention sub-block + residual, LN2, accumulator init ----
    @pl.when(j == 0)
    def _attention():
        x = x_ref[0].astype(jnp.float32)                 # (S, D)
        S, D = x.shape
        hd = D // heads_count
        n_kv = S // kv_tile                              # static

        h = _layer_norm(x, ln1_w_ref[...], ln1_b_ref[...])

        # Fused QKV projection: one (S, D) x (D, 3D) MXU pass, f32 accumulation.
        qkv = (jnp.dot(h.astype(wqkv_ref.dtype), wqkv_ref[...],
                       preferred_element_type=jnp.float32)
               + bqkv_ref[...].astype(jnp.float32))       # (S, 3D)

        # Fold the 1/sqrt(hd) scale into q; head-batched (H, S, hd) layout.
        scale = 1.0 / jnp.sqrt(jnp.float32(hd))
        q = (qkv[:, 0 * D:1 * D] * scale).reshape(S, heads_count, hd)
        k = qkv[:, 1 * D:2 * D].reshape(S, heads_count, hd)
        v = qkv[:, 2 * D:3 * D].reshape(S, heads_count, hd)

        q = jnp.transpose(q, (1, 0, 2)).astype(mm_dtype)   # (H, S, hd)
        k_s[...] = jnp.transpose(k, (1, 0, 2)).astype(k_s.dtype)
        v_s[...] = jnp.transpose(v, (1, 0, 2)).astype(v_s.dtype)

        # Flash-style online softmax over KV chunks: never materialize (H,S,S).
        def kv_step(i, carry):
            m_i, l_i, acc = carry
            start = pl.multiple_of(i * kv_tile, kv_tile)
            kc = k_s[:, pl.ds(start, kv_tile), :]          # (H, tkv, hd)
            vc = v_s[:, pl.ds(start, kv_tile), :]
            s = jnp.einsum("hqd,hkd->hqk", q, kc,
                           preferred_element_type=jnp.float32)     # (H, S, tkv)
            m_new = jnp.maximum(m_i, jnp.max(s, axis=-1, keepdims=True))
            alpha = jnp.exp(m_i - m_new)
            p = jnp.exp(s - m_new)
            l_new = alpha * l_i + jnp.sum(p, axis=-1, keepdims=True)
            acc_new = alpha * acc + jnp.einsum(
                "hqk,hkd->hqd", p.astype(mm_dtype), vc,
                preferred_element_type=jnp.float32)                # (H, S, hd)
            return m_new, l_new, acc_new

        m0 = jnp.full((heads_count, S, 1), -jnp.inf, jnp.float32)
        l0 = jnp.zeros((heads_count, S, 1), jnp.float32)
        a0 = jnp.zeros((heads_count, S, hd), jnp.float32)
        if n_kv == 1:
            _, l_f, acc_f = kv_step(0, (m0, l0, a0))
        else:
            _, l_f, acc_f = lax.fori_loop(0, n_kv, kv_step, (m0, l0, a0))

        # Softmax normalization on the EUP slot (approx reciprocal).
        ctx = acc_f * pl.reciprocal(l_f, approx=True)              # (H, S, hd)
        ctx = jnp.transpose(ctx, (1, 0, 2)).reshape(S, D)

        attn = (jnp.dot(ctx.astype(wo_ref.dtype), wo_ref[...],
                        preferred_element_type=jnp.float32)
                + bo_ref[...].astype(jnp.float32))

        x1 = x + attn                                    # first residual
        acc_s[...] = x1                                  # residual folded into MLP accumulator
        h2_s[...] = _layer_norm(x1, ln2_w_ref[...], ln2_b_ref[...]).astype(h2_s.dtype)

    # ---- every ff step: one (D, tff) / (tff, D) slice of the MLP ----
    ff = (jnp.dot(h2_s[...], w1_ref[...],
                  preferred_element_type=jnp.float32)
          + b1_ref[...].astype(jnp.float32))
    if approx_gelu:
        # tanh-approx GELU (routes to EUP; useful on v5e where f32 erf is VALU-heavy).
        c = jnp.sqrt(jnp.float32(2.0 / jnp.pi))
        ff = 0.5 * ff * (1.0 + jnp.tanh(c * (ff + 0.044715 * ff * ff * ff)))
    else:
        # Exact (erf-based) GELU, matching torch.nn.GELU() default numerics.
        ff = 0.5 * ff * (1.0 + lax.erf(ff * (1.0 / jnp.sqrt(jnp.float32(2.0)))))
    acc_s[...] += jnp.dot(ff.astype(w2_ref.dtype), w2_ref[...],
                          preferred_element_type=jnp.float32)

    # ---- last ff step: second residual + output bias, write out ----
    @pl.when(j == n_ff - 1)
    def _finalize():
        # TODO(synk): nn.Dropout(p=0.1) is identity in eval mode; no RNG applied.
        o_ref[0] = (acc_s[...] + b2_ref[...].astype(jnp.float32)).astype(o_ref.dtype)


def transformer_block(x, params, heads_count, *, ff_tile=None, kv_tile=None,
                      vmem_limit_bytes=None, approx_gelu=False):
    (ln1_w, ln1_b, wq, bq, wk, bk, wv, bv, wo, bo,
     ln2_w, ln2_b, w1, b1, w2, b2) = params
    B, S, D = x.shape
    Dff = w1.shape[1]
    assert D % heads_count == 0, "embeddings_dim must be divisible by heads_count"
    hd = D // heads_count
    # Note: production shapes should have D % 128 == 0 and head_dim >= 128 for
    # full MXU utilization; smaller dims run on padded/masked vregs.

    # Host-side fusion of the three Q/K/V projections into one (D, 3D) GEMM.
    wqkv = jnp.concatenate([wq, wk, wv], axis=1)      # (D, 3D)
    bqkv = jnp.concatenate([bq, bk, bv], axis=1)      # (1, 3D)

    wbytes = jnp.dtype(w1.dtype).itemsize
    xbytes = jnp.dtype(x.dtype).itemsize

    # ---- chip-aware VMEM budget (≈3/4 of physical, capped at 100 MiB) ----
    if vmem_limit_bytes is None:
        cap = 128 * 1024 * 1024
        try:
            cap = int(getattr(pltpu.get_tpu_info(), "vmem_capacity_bytes", cap))
        except Exception:
            pass
        vmem_limit_bytes = min(cap * 3 // 4, 100 * 1024 * 1024)

    # ---- KV tile for the flash-attention loop ----
    if kv_tile is None:
        kv_tile = S
        for t in (512, 256, 128):
            if S % t == 0:
                kv_tile = t
                break
    assert S % kv_tile == 0, "kv_tile must divide the sequence length"

    # ---- ff tile: largest multiple of 128 dividing Dff that fits the budget ----
    fixed_vmem = (
        2 * S * D * xbytes                                   # x block (double-buffered)
        + 2 * S * D * xbytes                                 # output block
        + 2 * (D * 3 * D + 3 * D) * wbytes                   # wqkv / bqkv
        + 2 * (D * D + D) * wbytes                           # wo / bo
        + 8 * D * 4                                          # LN params, b2 (approx)
        + S * D * 4                                          # acc_s (f32)
        + S * D * wbytes                                     # h2_s
        + 2 * S * D * wbytes                                 # k_s, v_s
        + (S * D + 2 * heads_count * S * kv_tile) * 4        # attention working set (q/ctx, scores chunk)
    )
    if ff_tile is None:
        budget = int(vmem_limit_bytes * 0.6)
        candidates = [t for t in range(128, min(Dff, 2048) + 1, 128) if Dff % t == 0]
        if not candidates:
            candidates = [Dff]
        ff_tile = candidates[0]
        for t in candidates:
            need = fixed_vmem + 2 * (2 * D * t + t) * wbytes + 2 * S * t * 4
            if need <= budget:
                ff_tile = t
    assert Dff % ff_tile == 0, "ff_tile must divide the MLP hidden dim"
    n_ff = Dff // ff_tile

    const2d = lambda shape: pl.BlockSpec(shape, lambda b, j: (0, 0))

    in_specs = [
        pl.BlockSpec((1, S, D), lambda b, j: (b, 0, 0)),     # x
        const2d((1, D)), const2d((1, D)),                    # ln1 w, b
        const2d((D, 3 * D)), const2d((1, 3 * D)),            # fused wqkv, bqkv
        const2d((D, D)), const2d((1, D)),                    # wo, bo
        const2d((1, D)), const2d((1, D)),                    # ln2 w, b
        pl.BlockSpec((D, ff_tile), lambda b, j: (0, j)),     # w1 chunk
        pl.BlockSpec((1, ff_tile), lambda b, j: (0, j)),     # b1 chunk
        pl.BlockSpec((ff_tile, D), lambda b, j: (j, 0)),     # w2 chunk
        const2d((1, D)),                                     # b2
    ]
    out_spec = pl.BlockSpec((1, S, D), lambda b, j: (b, 0, 0))

    kernel = functools.partial(transformer_block_kernel,
                               heads_count=heads_count,
                               kv_tile=kv_tile,
                               approx_gelu=approx_gelu)

    return pl.pallas_call(
        kernel,
        out_shape=jax.ShapeDtypeStruct((B, S, D), x.dtype),
        grid_spec=pltpu.PrefetchScalarGridSpec(
            num_scalar_prefetch=0,
            grid=(B, n_ff),
            in_specs=in_specs,
            out_specs=out_spec,
            scratch_shapes=[
                pltpu.VMEM((S, D), w1.dtype),                    # LN2(x1), matmul dtype
                pltpu.VMEM((S, D), jnp.float32),                 # x1 + MLP accumulator
                pltpu.VMEM((heads_count, S, hd), w1.dtype),      # K (head-batched)
                pltpu.VMEM((heads_count, S, hd), w1.dtype),      # V (head-batched)
            ],
        ),
        compiler_params=pltpu.CompilerParams(
            dimension_semantics=("parallel", "arbitrary"),
            vmem_limit_bytes=vmem_limit_bytes,
        ),
    )(x, ln1_w, ln1_b, wqkv, bqkv, wo, bo, ln2_w, ln2_b, w1, b1, w2, b2)


# ---------------- pure-JAX reference (for correctness check) ----------------
def reference_block(x, params, heads_count):
    (ln1_w, ln1_b, wq, bq, wk, bk, wv, bv, wo, bo,
     ln2_w, ln2_b, w1, b1, w2, b2) = params
    B, S, D = x.shape
    hd = D // heads_count

    def ln(v, w, b):
        mu = jnp.mean(v, axis=-1, keepdims=True)
        var = jnp.mean((v - mu) ** 2, axis=-1, keepdims=True)
        return (v - mu) / jnp.sqrt(var + 1e-5) * w + b

    residual = x
    h = ln(x, ln1_w, ln1_b)
    q = h @ wq + bq
    k = h @ wk + bk
    v = h @ wv + bv
    q = q.reshape(B, S, heads_count, hd).transpose(0, 2, 1, 3)
    k = k.reshape(B, S, heads_count, hd).transpose(0, 2, 1, 3)
    v = v.reshape(B, S, heads_count, hd).transpose(0, 2, 1, 3)
    scores = jnp.einsum("bhqd,bhkd->bhqk", q, k) / jnp.sqrt(jnp.float32(hd))
    p = jax.nn.softmax(scores, axis=-1)
    attn = jnp.einsum("bhqk,bhkd->bhqd", p, v).transpose(0, 2, 1, 3).reshape(B, S, D)
    attn = attn @ wo + bo
    x1 = residual + attn
    h2 = ln(x1, ln2_w, ln2_b)
    ff = h2 @ w1 + b1
    ff = jax.nn.gelu(ff, approximate=False)
    ff = ff @ w2 + b2
    return x1 + ff


if __name__ == "__main__":
    B, S, D, H = 2, 16, 64, 4
    Dff = 4 * D

    key = jax.random.PRNGKey(0)
    keys = jax.random.split(key, 12)

    x = jax.random.normal(keys[0], (B, S, D), dtype=jnp.float32)

    w_scale = 0.02
    params = (
        jnp.ones((1, D), jnp.float32),                                  # ln1 weight
        jnp.zeros((1, D), jnp.float32),                                 # ln1 bias
        w_scale * jax.random.normal(keys[1], (D, D), jnp.float32),      # wq
        w_scale * jax.random.normal(keys[2], (1, D), jnp.float32),      # bq
        w_scale * jax.random.normal(keys[3], (D, D), jnp.float32),      # wk
        w_scale * jax.random.normal(keys[4], (1, D), jnp.float32),      # bk
        w_scale * jax.random.normal(keys[5], (D, D), jnp.float32),      # wv
        w_scale * jax.random.normal(keys[6], (1, D), jnp.float32),      # bv
        w_scale * jax.random.normal(keys[7], (D, D), jnp.float32),      # wo
        w_scale * jax.random.normal(keys[8], (1, D), jnp.float32),      # bo
        jnp.ones((1, D), jnp.float32),                                  # ln2 weight
        jnp.zeros((1, D), jnp.float32),                                 # ln2 bias
        w_scale * jax.random.normal(keys[9], (D, Dff), jnp.float32),    # linear1 W
        w_scale * jax.random.normal(keys[10], (1, Dff), jnp.float32),   # linear1 b
        w_scale * jax.random.normal(keys[11], (Dff, D), jnp.float32),   # linear2 W
        jnp.zeros((1, D), jnp.float32),                                 # linear2 b
    )

    # ff_tile=128 -> two ff grid steps; kv_tile=8 -> two KV chunks, exercising both
    # the tiled/accumulated MLP path and the online-softmax attention loop.
    out = transformer_block(x, params, heads_count=H, ff_tile=128, kv_tile=8)
    out = jax.block_until_ready(out)

    ref = reference_block(x, params, heads_count=H)
    assert out.shape == (B, S, D)
    # tolerance covers the EUP approximate-reciprocal in the softmax normalization
    assert jnp.allclose(out, ref, atol=2e-3, rtol=2e-3), "mismatch vs reference"

    print("KERNEL_OK")
</pallas_src>

<mosaic_0001>
module attributes {stable_mosaic.version = 11 : i64} {
  func.func @transformer_block_kernel(%arg0: i32, %arg1: i32, %arg2: memref<1x16x64xf32, #tpu.memory_space<vmem>>, %arg3: memref<1x64xf32, #tpu.memory_space<vmem>>, %arg4: memref<1x64xf32, #tpu.memory_space<vmem>>, %arg5: memref<64x192xf32, #tpu.memory_space<vmem>>, %arg6: memref<1x192xf32, #tpu.memory_space<vmem>>, %arg7: memref<64x64xf32, #tpu.memory_space<vmem>>, %arg8: memref<1x64xf32, #tpu.memory_space<vmem>>, %arg9: memref<1x64xf32, #tpu.memory_space<vmem>>, %arg10: memref<1x64xf32, #tpu.memory_space<vmem>>, %arg11: memref<64x128xf32, #tpu.memory_space<vmem>>, %arg12: memref<1x128xf32, #tpu.memory_space<vmem>>, %arg13: memref<128x64xf32, #tpu.memory_space<vmem>>, %arg14: memref<1x64xf32, #tpu.memory_space<vmem>>, %arg15: memref<1x16x64xf32, #tpu.memory_space<vmem>>, %arg16: memref<16x64xf32, #tpu.memory_space<vmem>>, %arg17: memref<16x64xf32, #tpu.memory_space<vmem>>, %arg18: memref<4x16x16xf32, #tpu.memory_space<vmem>>, %arg19: memref<4x16x16xf32, #tpu.memory_space<vmem>>) attributes {dimension_semantics = [#tpu.dimension_semantics<parallel>, #tpu.dimension_semantics<arbitrary>], iteration_bounds = array<i64: 2, 2>, scalar_prefetch = 0 : i64, scratch_operands = 4 : i64, tpu.core_type = #tpu.core_type<tc>, window_params = [{transform_indices = @transform_0, window_bounds = array<i64: 1, 16, 64>}, {pipeline_mode = #tpu.pipeline_mode<synchronous>, transform_indices = @transform_1, window_bounds = array<i64: 1, 64>}, {pipeline_mode = #tpu.pipeline_mode<synchronous>, transform_indices = @transform_2, window_bounds = array<i64: 1, 64>}, {pipeline_mode = #tpu.pipeline_mode<synchronous>, transform_indices = @transform_3, window_bounds = array<i64: 64, 192>}, {pipeline_mode = #tpu.pipeline_mode<synchronous>, transform_indices = @transform_4, window_bounds = array<i64: 1, 192>}, {pipeline_mode = #tpu.pipeline_mode<synchronous>, transform_indices = @transform_5, window_bounds = array<i64: 64, 64>}, {pipeline_mode = #tpu.pipeline_mode<synchronous>, transform_indices = @transform_6, window_bounds = array<i64: 1, 64>}, {pipeline_mode = #tpu.pipeline_mode<synchronous>, transform_indices = @transform_7, window_bounds = array<i64: 1, 64>}, {pipeline_mode = #tpu.pipeline_mode<synchronous>, transform_indices = @transform_8, window_bounds = array<i64: 1, 64>}, {transform_indices = @transform_9, window_bounds = array<i64: 64, 128>}, {transform_indices = @transform_10, window_bounds = array<i64: 1, 128>}, {transform_indices = @transform_11, window_bounds = array<i64: 128, 64>}, {pipeline_mode = #tpu.pipeline_mode<synchronous>, transform_indices = @transform_12, window_bounds = array<i64: 1, 64>}, {transform_indices = @transform_13, window_bounds = array<i64: 1, 16, 64>}]} {
    %c0_i32 = arith.constant 0 : i32
    %0 = arith.cmpi eq, %arg1, %c0_i32 : i32
    %1 = arith.extui %0 : i1 to i32
    %c0_i32_0 = arith.constant 0 : i32
    %2 = arith.cmpi ne, %1, %c0_i32_0 : i32
    scf.if %2 {
      %c0_18 = arith.constant 0 : index
      %c0_19 = arith.constant 0 : index
      %c0_20 = arith.constant 0 : index
      %27 = vector.load %arg2[%c0_18, %c0_19, %c0_20] : memref<1x16x64xf32, #tpu.memory_space<vmem>>, vector<1x16x64xf32>
      %28 = vector.shape_cast %27 : vector<1x16x64xf32> to vector<16x64xf32>
      %c0_21 = arith.constant 0 : index
      %c0_22 = arith.constant 0 : index
      %29 = vector.load %arg3[%c0_21, %c0_22] : memref<1x64xf32, #tpu.memory_space<vmem>>, vector<1x64xf32>
      %c0_23 = arith.constant 0 : index
      %c0_24 = arith.constant 0 : index
      %30 = vector.load %arg4[%c0_23, %c0_24] : memref<1x64xf32, #tpu.memory_space<vmem>>, vector<1x64xf32>
      %cst_25 = arith.constant dense<0.000000e+00> : vector<16xf32>
      %31 = vector.multi_reduction <add>, %28, %cst_25 [1] : vector<16x64xf32> to vector<16xf32>
      %32 = vector.shape_cast %31 : vector<16xf32> to vector<16x1xf32>
      %cst_26 = arith.constant 6.400000e+01 : f32
      %33 = vector.broadcast %cst_26 : f32 to vector<16x1xf32>
      %34 = arith.divf %32, %33 : vector<16x1xf32>
      %35 = vector.broadcast %34 : vector<16x1xf32> to vector<16x64xf32>
      %36 = arith.subf %28, %35 : vector<16x64xf32>
      %37 = arith.mulf %36, %36 : vector<16x64xf32>
      %cst_27 = arith.constant dense<0.000000e+00> : vector<16xf32>
      %38 = vector.multi_reduction <add>, %37, %cst_27 [1] : vector<16x64xf32> to vector<16xf32>
      %39 = vector.shape_cast %38 : vector<16xf32> to vector<16x1xf32>
      %cst_28 = arith.constant 6.400000e+01 : f32
      %40 = vector.broadcast %cst_28 : f32 to vector<16x1xf32>
      %41 = arith.divf %39, %40 : vector<16x1xf32>
      %42 = vector.broadcast %34 : vector<16x1xf32> to vector<16x64xf32>
      %43 = arith.subf %28, %42 : vector<16x64xf32>
      %cst_29 = arith.constant 9.99999974E-6 : f32
      %44 = vector.broadcast %cst_29 : f32 to vector<16x1xf32>
      %45 = arith.addf %41, %44 : vector<16x1xf32>
      %46 = math.rsqrt %45 : vector<16x1xf32>
      %47 = vector.broadcast %46 : vector<16x1xf32> to vector<16x64xf32>
      %48 = arith.mulf %43, %47 : vector<16x64xf32>
      %49 = vector.broadcast %29 : vector<1x64xf32> to vector<16x64xf32>
      %50 = arith.mulf %48, %49 : vector<16x64xf32>
      %51 = vector.broadcast %30 : vector<1x64xf32> to vector<16x64xf32>
      %52 = arith.addf %50, %51 : vector<16x64xf32>
      %c0_30 = arith.constant 0 : index
      %c0_31 = arith.constant 0 : index
      %53 = vector.load %arg5[%c0_30, %c0_31] : memref<64x192xf32, #tpu.memory_space<vmem>>, vector<64x192xf32>
      %cst_32 = arith.constant dense<0.000000e+00> : vector<16x192xf32>
      %54 = tpu.matmul %52, %53, %cst_32 {dimension_numbers = #tpu.dot_dimension_numbers<[1], [0], [0], [1], [0, 0, 1, 1], [], []>} : vector<16x64xf32>, vector<64x192xf32>, vector<16x192xf32> -> vector<16x192xf32>
      %c0_33 = arith.constant 0 : index
      %c0_34 = arith.constant 0 : index
      %55 = vector.load %arg6[%c0_33, %c0_34] : memref<1x192xf32, #tpu.memory_space<vmem>>, vector<1x192xf32>
      %56 = vector.broadcast %55 : vector<1x192xf32> to vector<16x192xf32>
      %57 = arith.addf %54, %56 : vector<16x192xf32>
      %cst_35 = arith.constant 1.600000e+01 : f32
      %58 = math.sqrt %cst_35 : f32
      %cst_36 = arith.constant 1.000000e+00 : f32
      %59 = arith.divf %cst_36, %58 : f32
      %60 = vector.extract_strided_slice %57 {offsets = [0, 0], sizes = [16, 64], strides = [1, 1]} : vector<16x192xf32> to vector<16x64xf32>
      %61 = vector.broadcast %59 : f32 to vector<16x64xf32>
      %62 = arith.mulf %60, %61 : vector<16x64xf32>
      %63 = vector.shape_cast %62 : vector<16x64xf32> to vector<16x4x16xf32>
      %64 = vector.extract_strided_slice %57 {offsets = [0, 64], sizes = [16, 64], strides = [1, 1]} : vector<16x192xf32> to vector<16x64xf32>
      %65 = vector.shape_cast %64 : vector<16x64xf32> to vector<16x4x16xf32>
      %66 = vector.extract_strided_slice %57 {offsets = [0, 128], sizes = [16, 64], strides = [1, 1]} : vector<16x192xf32> to vector<16x64xf32>
      %67 = vector.shape_cast %66 : vector<16x64xf32> to vector<16x4x16xf32>
      %68 = tpu.transpose %63, [1, 0, 2] : vector<16x4x16xf32> -> vector<4x16x16xf32>
      %69 = tpu.transpose %65, [1, 0, 2] : vector<16x4x16xf32> -> vector<4x16x16xf32>
      %c0_37 = arith.constant 0 : index
      %c0_38 = arith.constant 0 : index
      %c0_39 = arith.constant 0 : index
      %70 = vector.load %arg18[%c0_37, %c0_38, %c0_39] : memref<4x16x16xf32, #tpu.memory_space<vmem>>, vector<4x16x16xf32>
      tpu.vector_store %arg18[%c0_37, %c0_38, %c0_39], %69 {strides = array<i32>} : memref<4x16x16xf32, #tpu.memory_space<vmem>>, vector<4x16x16xf32>,
      %71 = tpu.transpose %67, [1, 0, 2] : vector<16x4x16xf32> -> vector<4x16x16xf32>
      %c0_40 = arith.constant 0 : index
      %c0_41 = arith.constant 0 : index
      %c0_42 = arith.constant 0 : index
      %72 = vector.load %arg19[%c0_40, %c0_41, %c0_42] : memref<4x16x16xf32, #tpu.memory_space<vmem>>, vector<4x16x16xf32>
      tpu.vector_store %arg19[%c0_40, %c0_41, %c0_42], %71 {strides = array<i32>} : memref<4x16x16xf32, #tpu.memory_space<vmem>>, vector<4x16x16xf32>,
      %cst_43 = arith.constant 0xFF800000 : f32
      %73 = vector.broadcast %cst_43 : f32 to vector<4x16x1xf32>
      %cst_44 = arith.constant 0.000000e+00 : f32
      %74 = vector.broadcast %cst_44 : f32 to vector<4x16x1xf32>
      %cst_45 = arith.constant 0.000000e+00 : f32
      %75 = vector.broadcast %cst_45 : f32 to vector<4x16x16xf32>
      %c0_i32_46 = arith.constant 0 : i32
      %c2_i32 = arith.constant 2 : i32
      %76 = arith.addi %c0_i32_46, %c2_i32 : i32
      %c1_i32_47 = arith.constant 1 : i32
      %77:3 = scf.for %arg20 = %c0_i32_46 to %76 step %c1_i32_47 iter_args(%arg21 = %73, %arg22 = %74, %arg23 = %75) -> (vector<4x16x1xf32>, vector<4x16x1xf32>, vector<4x16x16xf32>)  : i32 {
        %c8_i32 = arith.constant 8 : i32
        %115 = arith.muli %arg20, %c8_i32 : i32
        %116 = tpu.assume_multiple %115, 8 : i32
        %c0_67 = arith.constant 0 : index
        %117 = arith.index_cast %116 : i32 to index
        %c0_68 = arith.constant 0 : index
        %118 = vector.load %arg18[%c0_67, %117, %c0_68] : memref<4x16x16xf32, #tpu.memory_space<vmem>>, vector<4x8x16xf32>
        %c0_69 = arith.constant 0 : index
        %119 = arith.index_cast %116 : i32 to index
        %c0_70 = arith.constant 0 : index
        %120 = vector.load %arg19[%c0_69, %119, %c0_70] : memref<4x16x16xf32, #tpu.memory_space<vmem>>, vector<4x8x16xf32>
        "tpu.trace_start"() <{level = 10 : i32, message = "hqd,hkd->hqk"}> : () -> ()
        %cst_71 = arith.constant dense<0.000000e+00> : vector<4x16x8xf32>
        %121 = tpu.matmul %68, %118, %cst_71 {dimension_numbers = #tpu.dot_dimension_numbers<[2], [2], [1], [1], [0, 0, 0, 1, 1, 1], [0], [0]>} : vector<4x16x16xf32>, vector<4x8x16xf32>, vector<4x16x8xf32> -> vector<4x16x8xf32>
        "tpu.trace_stop"() : () -> ()
        %cst_72 = arith.constant dense<0xFF800000> : vector<4x16xf32>
        %122 = vector.multi_reduction <maximumf>, %121, %cst_72 [2] : vector<4x16x8xf32> to vector<4x16xf32>
        %123 = vector.shape_cast %122 : vector<4x16xf32> to vector<4x16x1xf32>
        %124 = arith.maximumf %arg21, %123 : vector<4x16x1xf32>
        %125 = arith.subf %arg21, %124 : vector<4x16x1xf32>
        %126 = math.exp %125 : vector<4x16x1xf32>
        %127 = vector.broadcast %124 : vector<4x16x1xf32> to vector<4x16x8xf32>
        %128 = arith.subf %121, %127 : vector<4x16x8xf32>
        %129 = math.exp %128 : vector<4x16x8xf32>
        %130 = arith.mulf %126, %arg22 : vector<4x16x1xf32>
        %cst_73 = arith.constant dense<0.000000e+00> : vector<4x16xf32>
        %131 = vector.multi_reduction <add>, %129, %cst_73 [2] : vector<4x16x8xf32> to vector<4x16xf32>
        %132 = vector.shape_cast %131 : vector<4x16xf32> to vector<4x16x1xf32>
        %133 = arith.addf %130, %132 : vector<4x16x1xf32>
        %134 = vector.broadcast %126 : vector<4x16x1xf32> to vector<4x16x16xf32>
        %135 = arith.mulf %134, %arg23 : vector<4x16x16xf32>
        "tpu.trace_start"() <{level = 10 : i32, message = "hqk,hkd->hqd"}> : () -> ()
        %cst_74 = arith.constant dense<0.000000e+00> : vector<4x16x16xf32>
        %136 = tpu.matmul %129, %120, %cst_74 {dimension_numbers = #tpu.dot_dimension_numbers<[2], [1], [1], [2], [0, 0, 0, 1, 1, 2], [0], [0]>} : vector<4x16x8xf32>, vector<4x8x16xf32>, vector<4x16x16xf32> -> vector<4x16x16xf32>
        "tpu.trace_stop"() : () -> ()
        %137 = arith.addf %135, %136 : vector<4x16x16xf32>
        scf.yield %124, %133, %137 : vector<4x16x1xf32>, vector<4x16x1xf32>, vector<4x16x16xf32>
      }
      %c2_i32_48 = arith.constant 2 : i32
      %78 = tpu.reciprocal %77#1 {approx = true} : vector<4x16x1xf32> -> vector<4x16x1xf32>
      %79 = vector.broadcast %78 : vector<4x16x1xf32> to vector<4x16x16xf32>
      %80 = arith.mulf %77#2, %79 : vector<4x16x16xf32>
      %81 = tpu.transpose %80, [1, 0, 2] : vector<4x16x16xf32> -> vector<16x4x16xf32>
      %82 = vector.shape_cast %81 : vector<16x4x16xf32> to vector<16x64xf32>
      %c0_49 = arith.constant 0 : index
      %c0_50 = arith.constant 0 : index
      %83 = vector.load %arg7[%c0_49, %c0_50] : memref<64x64xf32, #tpu.memory_space<vmem>>, vector<64x64xf32>
      %cst_51 = arith.constant dense<0.000000e+00> : vector<16x64xf32>
      %84 = tpu.matmul %82, %83, %cst_51 {dimension_numbers = #tpu.dot_dimension_numbers<[1], [0], [0], [1], [0, 0, 1, 1], [], []>} : vector<16x64xf32>, vector<64x64xf32>, vector<16x64xf32> -> vector<16x64xf32>
      %c0_52 = arith.constant 0 : index
      %c0_53 = arith.constant 0 : index
      %85 = vector.load %arg8[%c0_52, %c0_53] : memref<1x64xf32, #tpu.memory_space<vmem>>, vector<1x64xf32>
      %86 = vector.broadcast %85 : vector<1x64xf32> to vector<16x64xf32>
      %87 = arith.addf %84, %86 : vector<16x64xf32>
      %88 = arith.addf %28, %87 : vector<16x64xf32>
      %c0_54 = arith.constant 0 : index
      %c0_55 = arith.constant 0 : index
      %89 = vector.load %arg17[%c0_54, %c0_55] : memref<16x64xf32, #tpu.memory_space<vmem>>, vector<16x64xf32>
      tpu.vector_store %arg17[%c0_54, %c0_55], %88 {strides = array<i32>} : memref<16x64xf32, #tpu.memory_space<vmem>>, vector<16x64xf32>,
      %c0_56 = arith.constant 0 : index
      %c0_57 = arith.constant 0 : index
      %90 = vector.load %arg9[%c0_56, %c0_57] : memref<1x64xf32, #tpu.memory_space<vmem>>, vector<1x64xf32>
      %c0_58 = arith.constant 0 : index
      %c0_59 = arith.constant 0 : index
      %91 = vector.load %arg10[%c0_58, %c0_59] : memref<1x64xf32, #tpu.memory_space<vmem>>, vector<1x64xf32>
      %cst_60 = arith.constant dense<0.000000e+00> : vector<16xf32>
      %92 = vector.multi_reduction <add>, %88, %cst_60 [1] : vector<16x64xf32> to vector<16xf32>
      %93 = vector.shape_cast %92 : vector<16xf32> to vector<16x1xf32>
      %cst_61 = arith.constant 6.400000e+01 : f32
      %94 = vector.broadcast %cst_61 : f32 to vector<16x1xf32>
      %95 = arith.divf %93, %94 : vector<16x1xf32>
      %96 = vector.broadcast %95 : vector<16x1xf32> to vector<16x64xf32>
      %97 = arith.subf %88, %96 : vector<16x64xf32>
      %98 = arith.mulf %97, %97 : vector<16x64xf32>
      %cst_62 = arith.constant dense<0.000000e+00> : vector<16xf32>
      %99 = vector.multi_reduction <add>, %98, %cst_62 [1] : vector<16x64xf32> to vector<16xf32>
      %100 = vector.shape_cast %99 : vector<16xf32> to vector<16x1xf32>
      %cst_63 = arith.constant 6.400000e+01 : f32
      %101 = vector.broadcast %cst_63 : f32 to vector<16x1xf32>
      %102 = arith.divf %100, %101 : vector<16x1xf32>
      %103 = vector.broadcast %95 : vector<16x1xf32> to vector<16x64xf32>
      %104 = arith.subf %88, %103 : vector<16x64xf32>
      %cst_64 = arith.constant 9.99999974E-6 : f32
      %105 = vector.broadcast %cst_64 : f32 to vector<16x1xf32>
      %106 = arith.addf %102, %105 : vector<16x1xf32>
      %107 = math.rsqrt %106 : vector<16x1xf32>
      %108 = vector.broadcast %107 : vector<16x1xf32> to vector<16x64xf32>
      %109 = arith.mulf %104, %108 : vector<16x64xf32>
      %110 = vector.broadcast %90 : vector<1x64xf32> to vector<16x64xf32>
      %111 = arith.mulf %109, %110 : vector<16x64xf32>
      %112 = vector.broadcast %91 : vector<1x64xf32> to vector<16x64xf32>
      %113 = arith.addf %111, %112 : vector<16x64xf32>
      %c0_65 = arith.constant 0 : index
      %c0_66 = arith.constant 0 : index
      %114 = vector.load %arg16[%c0_65, %c0_66] : memref<16x64xf32, #tpu.memory_space<vmem>>, vector<16x64xf32>
      tpu.vector_store %arg16[%c0_65, %c0_66], %113 {strides = array<i32>} : memref<16x64xf32, #tpu.memory_space<vmem>>, vector<16x64xf32>,
    } else {
    }
    %c0 = arith.constant 0 : index
    %c0_1 = arith.constant 0 : index
    %3 = vector.load %arg16[%c0, %c0_1] : memref<16x64xf32, #tpu.memory_space<vmem>>, vector<16x64xf32>
    %c0_2 = arith.constant 0 : index
    %c0_3 = arith.constant 0 : index
    %4 = vector.load %arg11[%c0_2, %c0_3] : memref<64x128xf32, #tpu.memory_space<vmem>>, vector<64x128xf32>
    %cst = arith.constant dense<0.000000e+00> : vector<16x128xf32>
    %5 = tpu.matmul %3, %4, %cst {dimension_numbers = #tpu.dot_dimension_numbers<[1], [0], [0], [1], [0, 0, 1, 1], [], []>} : vector<16x64xf32>, vector<64x128xf32>, vector<16x128xf32> -> vector<16x128xf32>
    %c0_4 = arith.constant 0 : index
    %c0_5 = arith.constant 0 : index
    %6 = vector.load %arg12[%c0_4, %c0_5] : memref<1x128xf32, #tpu.memory_space<vmem>>, vector<1x128xf32>
    %7 = vector.broadcast %6 : vector<1x128xf32> to vector<16x128xf32>
    %8 = arith.addf %5, %7 : vector<16x128xf32>
    %cst_6 = arith.constant 5.000000e-01 : f32
    %9 = vector.broadcast %cst_6 : f32 to vector<16x128xf32>
    %10 = arith.mulf %9, %8 : vector<16x128xf32>
    %cst_7 = arith.constant 2.000000e+00 : f32
    %11 = math.sqrt %cst_7 : f32
    %cst_8 = arith.constant 1.000000e+00 : f32
    %12 = arith.divf %cst_8, %11 : f32
    %13 = vector.broadcast %12 : f32 to vector<16x128xf32>
    %14 = arith.mulf %8, %13 : vector<16x128xf32>
    %15 = math.erf %14 : vector<16x128xf32>
    %cst_9 = arith.constant 1.000000e+00 : f32
    %16 = vector.broadcast %cst_9 : f32 to vector<16x128xf32>
    %17 = arith.addf %16, %15 : vector<16x128xf32>
    %18 = arith.mulf %10, %17 : vector<16x128xf32>
    %c0_10 = arith.constant 0 : index
    %c0_11 = arith.constant 0 : index
    %19 = vector.load %arg17[%c0_10, %c0_11] : memref<16x64xf32, #tpu.memory_space<vmem>>, vector<16x64xf32>
    %c0_12 = arith.constant 0 : index
    %c0_13 = arith.constant 0 : index
    %20 = vector.load %arg13[%c0_12, %c0_13] : memref<128x64xf32, #tpu.memory_space<vmem>>, vector<128x64xf32>
    %cst_14 = arith.constant dense<0.000000e+00> : vector<16x64xf32>
    %21 = tpu.matmul %18, %20, %cst_14 {dimension_numbers = #tpu.dot_dimension_numbers<[1], [0], [0], [1], [0, 0, 1, 1], [], []>} : vector<16x128xf32>, vector<128x64xf32>, vector<16x64xf32> -> vector<16x64xf32>
    %22 = arith.addf %19, %21 : vector<16x64xf32>
    %c0_15 = arith.constant 0 : index
    %c0_16 = arith.constant 0 : index
    %23 = vector.load %arg17[%c0_15, %c0_16] : memref<16x64xf32, #tpu.memory_space<vmem>>, vector<16x64xf32>
    tpu.vector_store %arg17[%c0_15, %c0_16], %22 {strides = array<i32>} : memref<16x64xf32, #tpu.memory_space<vmem>>, vector<16x64xf32>,
    %c1_i32 = arith.constant 1 : i32
    %24 = arith.cmpi eq, %arg1, %c1_i32 : i32
    %25 = arith.extui %24 : i1 to i32
    %c0_i32_17 = arith.constant 0 : i32
    %26 = arith.cmpi ne, %25, %c0_i32_17 : i32
    scf.if %26 {
      %c0_18 = arith.constant 0 : index
      %c0_19 = arith.constant 0 : index
      %27 = vector.load %arg17[%c0_18, %c0_19] : memref<16x64xf32, #tpu.memory_space<vmem>>, vector<16x64xf32>
      %c0_20 = arith.constant 0 : index
      %c0_21 = arith.constant 0 : index
      %28 = vector.load %arg14[%c0_20, %c0_21] : memref<1x64xf32, #tpu.memory_space<vmem>>, vector<1x64xf32>
      %29 = vector.broadcast %28 : vector<1x64xf32> to vector<16x64xf32>
      %30 = arith.addf %27, %29 : vector<16x64xf32>
      %c0_22 = arith.constant 0 : index
      %c0_23 = arith.constant 0 : index
      %c0_24 = arith.constant 0 : index
      %31 = vector.load %arg15[%c0_22, %c0_23, %c0_24] : memref<1x16x64xf32, #tpu.memory_space<vmem>>, vector<1x16x64xf32>
      %32 = vector.shape_cast %31 : vector<1x16x64xf32> to vector<16x64xf32>
      %33 = vector.shape_cast %30 : vector<16x64xf32> to vector<1x16x64xf32>
      tpu.vector_store %arg15[%c0_22, %c0_23, %c0_24], %33 {strides = array<i32>} : memref<1x16x64xf32, #tpu.memory_space<vmem>>, vector<1x16x64xf32>,
    } else {
    }
    return
  }
  func.func @transform_0(%arg0: i32, %arg1: i32) -> (i32, i32, i32) {
    %c0_i32 = arith.constant 0 : i32
    %c0_i32_0 = arith.constant 0 : i32
    %c0_i32_1 = arith.constant 0 : i32
    return %arg0, %c0_i32, %c0_i32_0 : i32, i32, i32
  }
  func.func @transform_1(%arg0: i32, %arg1: i32) -> (i32, i32) {
    %c0_i32 = arith.constant 0 : i32
    %c0_i32_0 = arith.constant 0 : i32
    %c0_i32_1 = arith.constant 0 : i32
    return %c0_i32, %c0_i32_0 : i32, i32
  }
  func.func @transform_2(%arg0: i32, %arg1: i32) -> (i32, i32) {
    %c0_i32 = arith.constant 0 : i32
    %c0_i32_0 = arith.constant 0 : i32
    %c0_i32_1 = arith.constant 0 : i32
    return %c0_i32, %c0_i32_0 : i32, i32
  }
  func.func @transform_3(%arg0: i32, %arg1: i32) -> (i32, i32) {
    %c0_i32 = arith.constant 0 : i32
    %c0_i32_0 = arith.constant 0 : i32
    %c0_i32_1 = arith.constant 0 : i32
    return %c0_i32, %c0_i32_0 : i32, i32
  }
  func.func @transform_4(%arg0: i32, %arg1: i32) -> (i32, i32) {
    %c0_i32 = arith.constant 0 : i32
    %c0_i32_0 = arith.constant 0 : i32
    %c0_i32_1 = arith.constant 0 : i32
    return %c0_i32, %c0_i32_0 : i32, i32
  }
  func.func @transform_5(%arg0: i32, %arg1: i32) -> (i32, i32) {
    %c0_i32 = arith.constant 0 : i32
    %c0_i32_0 = arith.constant 0 : i32
    %c0_i32_1 = arith.constant 0 : i32
    return %c0_i32, %c0_i32_0 : i32, i32
  }
  func.func @transform_6(%arg0: i32, %arg1: i32) -> (i32, i32) {
    %c0_i32 = arith.constant 0 : i32
    %c0_i32_0 = arith.constant 0 : i32
    %c0_i32_1 = arith.constant 0 : i32
    return %c0_i32, %c0_i32_0 : i32, i32
  }
  func.func @transform_7(%arg0: i32, %arg1: i32) -> (i32, i32) {
    %c0_i32 = arith.constant 0 : i32
    %c0_i32_0 = arith.constant 0 : i32
    %c0_i32_1 = arith.constant 0 : i32
    return %c0_i32, %c0_i32_0 : i32, i32
  }
  func.func @transform_8(%arg0: i32, %arg1: i32) -> (i32, i32) {
    %c0_i32 = arith.constant 0 : i32
    %c0_i32_0 = arith.constant 0 : i32
    %c0_i32_1 = arith.constant 0 : i32
    return %c0_i32, %c0_i32_0 : i32, i32
  }
  func.func @transform_9(%arg0: i32, %arg1: i32) -> (i32, i32) {
    %c0_i32 = arith.constant 0 : i32
    %c0_i32_0 = arith.constant 0 : i32
    return %c0_i32, %arg1 : i32, i32
  }
  func.func @transform_10(%arg0: i32, %arg1: i32) -> (i32, i32) {
    %c0_i32 = arith.constant 0 : i32
    %c0_i32_0 = arith.constant 0 : i32
    return %c0_i32, %arg1 : i32, i32
  }
  func.func @transform_11(%arg0: i32, %arg1: i32) -> (i32, i32) {
    %c0_i32 = arith.constant 0 : i32
    %c0_i32_0 = arith.constant 0 : i32
    return %arg1, %c0_i32 : i32, i32
  }
  func.func @transform_12(%arg0: i32, %arg1: i32) -> (i32, i32) {
    %c0_i32 = arith.constant 0 : i32
    %c0_i32_0 = arith.constant 0 : i32
    %c0_i32_1 = arith.constant 0 : i32
    return %c0_i32, %c0_i32_0 : i32, i32
  }
  func.func @transform_13(%arg0: i32, %arg1: i32) -> (i32, i32, i32) {
    %c0_i32 = arith.constant 0 : i32
    %c0_i32_0 = arith.constant 0 : i32
    %c0_i32_1 = arith.constant 0 : i32
    return %arg0, %c0_i32, %c0_i32_0 : i32, i32, i32
  }
}

</mosaic_0001>

<bundles_post_ra>
// kernel: tpu_custom_call.1
= control target key start
LH: loop header
LB: loop body
LE: loop exit
PB: predicated region body
PF: predicated region fallthrough
CT: control target
= control target key end

     0   :  { %s6639_s0 = inlined_call_operand.hbm [shape: f32[2,16,64], index: 0, kind: input, shape index: {}]   ;;  %s6640_s1 = inlined_call_operand.hbm [shape: f32[1,64], index: 1, kind: input, shape index: {}]   ;;  %s6641_s2 = inlined_call_operand.hbm [shape: f32[1,64], index: 2, kind: input, shape index: {}]   ;;  %s6642_s3 = inlined_call_operand.hbm [shape: f32[64,192], index: 3, kind: input, shape index: {}]   ;;  %s6643_s4 = inlined_call_operand.hbm [shape: f32[1,192], index: 4, kind: input, shape index: {}]   ;;  %s6644_s5 = inlined_call_operand.hbm [shape: f32[64,64], index: 5, kind: input, shape index: {}]   ;;  %s6645_s6 = inlined_call_operand.hbm [shape: f32[1,64], index: 6, kind: input, shape index: {}]   ;;  %s6646_s7 = inlined_call_operand.hbm [shape: f32[1,64], index: 7, kind: input, shape index: {}]   ;;  %s6647_s8 = inlined_call_operand.hbm [shape: f32[1,64], index: 8, kind: input, shape index: {}]   ;;  %s6648_s9 = inlined_call_operand.hbm [shape: f32[64,256], index: 9, kind: input, shape index: {}]   ;;  %s6649_s10 = inlined_call_operand.hbm [shape: f32[1,256], index: 10, kind: input, shape index: {}]   ;;  %s6650_s11 = inlined_call_operand.hbm [shape: f32[256,64], index: 11, kind: input, shape index: {}]   ;;  %s6651_s12 = inlined_call_operand.hbm [shape: f32[1,64], index: 12, kind: input, shape index: {}]   ;;  %s6652_s13 = inlined_call_operand.hbm [shape: f32[2,16,64], index: 13, kind: output, shape index: {}]  }
   0x1   :  { %6691 = sst [smem:[#allocation50_spill]] %s6639_s0 }
   0x2   :  { %6692 = sst [smem:[#allocation51_spill]] %s6640_s1 }
   0x3   :  { %6693 = sst [smem:[#allocation52_spill]] %s6641_s2 }
   0x4   :  { %6694 = sst [smem:[#allocation53_spill]] %s6642_s3 }
   0x5   :  { %6695 = sst [smem:[#allocation54_spill]] %s6643_s4 }
   0x6   :  { %6696 = sst [smem:[#allocation55_spill]] %s6644_s5 }
   0x7   :  { %6697 = sst [smem:[#allocation56_spill]] %s6645_s6 }
   0x8   :  { %6698 = sst [smem:[#allocation57_spill]] %s6646_s7 }
   0x9   :  { %6699 = sst [smem:[#allocation58_spill]] %s6647_s8 }
   0xa   :  { %6700 = sst [smem:[#allocation59_spill]] %s6648_s9 }
   0xb   :  { %6701 = sst [smem:[#allocation60_spill]] %s6649_s10 }
   0xc   :  { %6702 = sst [smem:[#allocation61_spill]] %s6650_s11 }
   0xd   :  { %6703 = sst [smem:[#allocation62_spill]] %s6651_s12 }
   0xe   :  { %6704 = sst [smem:[#allocation63_spill]] %s6652_s13 }
   0xf   :  { %18 = vsyncpa [#allocation7], 0 }
  0x10   :  { %20 = vsyncpa [#allocation7 + $0x1], 0 }
  0x11   :  { %21 = vsyncpa [#allocation10], 0 }
  0x12   :  { %22 = vsyncpa [#allocation13], 0 }
  0x13   :  { %23 = vsyncpa [#allocation16], 0 }
  0x14   :  { %24 = vsyncpa [#allocation19], 0 }
  0x15   :  { %25 = vsyncpa [#allocation22], 0 }
  0x16   :  { %27 = vsyncpa [#allocation22 + $0x1], 0 }
  0x17   :  { %28 = vsyncpa [#allocation25], 0 }
  0x18   :  { %30 = vsyncpa [#allocation25 + $0x1], 0 }
  0x19   :  { %31 = vsyncpa [#allocation8], 0 }
  0x1a   :  { %33 = vsyncpa [#allocation8 + $0x1], 0  ;;  %s5295_s25 = smov 0   ;;  %s5297_s26 = smov 0  }
  0x1b   :  { %s5299_s27 = smov 0   ;;  %s5301_s28 = smov 0  }
  0x1c   :  { %s5303_s29 = smov 0   ;;  %s5305_s30 = smov 0  }
  0x1d   :  { %s5307_s14 = smov 0   ;;  %s5309_s15 = smov 0  }
  0x1e   :  { %s5311_s16 = smov 0   ;;  %s5313_s17 = smov 0  }
  0x1f   :  { %s5315_s18 = smov 0  }
  0x20 LB: > { %6705 = sst [smem:[#allocation37_spill]] %s5061_s27  ;;  %s5351_s19 = sadd.s32 4294967295, %s5093_s18   ;;  %s5093_s18 = sphi %s5315_s18, %s39_s18   ;;  %s5089_s17 = sphi %s5313_s17, %s6838_s17   ;;  %s5085_s16 = sphi %s5311_s16, %s6843_s16   ;;  %s5081_s15 = sphi %s5309_s15, %s6842_s15   ;;  %s5077_s14 = sphi %s5307_s14, %s6841_s14   ;;  %s5073_s30 = sphi %s5305_s30, %s6835_s30   ;;  %s5069_s29 = sphi %s5303_s29, %s6834_s29   ;;  %s5065_s28 = sphi %s5301_s28, %s6833_s28   ;;  %s5061_s27 = sphi %s5299_s27, %s6832_s27   ;;  %s5057_s26 = sphi %s5297_s26, %s6840_s26   ;;  %s5053_s25 = sphi %s5295_s25, %s6839_s25  }
  0x21   : > { %6706 = sst [smem:[#allocation38_spill]] %s5065_s28  ;;  %p3630_p0 = scmp.ge.s32.totalorder %s5093_s18, 1 }
  0x22   : > { %6707 = sst [smem:[#allocation39_spill]] %s5069_s29  ;;  %p6659_p1 = scmp.eq.s32.totalorder %s5351_s19, 0 }
  0x23   : > { %6708 = sst [smem:[#allocation40_spill]] %s5073_s30  ;;  %p375_p2 = scmp.lt.s32.totalorder %s5093_s18, 5 }
  0x24   : > { %6709 = sst [smem:[#allocation41_spill]] %s5077_s14  ;;  %s5195_s21 = smov [#allocation9]  }
  0x25   : > { %6710 = sst [smem:[#allocation42_spill]] %s5081_s15  ;;  %p5356_p3 = pnand %p3630_p0, %p375_p2 }
  0x26   : > { %6711 = sst [smem:[#allocation43_spill]] %s5089_s17  ;;  %s388_s22 = sshll.u32 %s5195_s21, 4  ;;  %s389_s22 = int_to_ptr.vmem [resolvable:$true] %s388_s22 }
  0x27   : > { %s6712_s20 = scalar_select %p5356_p3, 1, 0 }
  0x28   : > { %p4033_p4 = pneg %p5356_p3  ;;  %s5196_s23 = smov [#allocation12]  }
  0x29   : > { %6713 = sst [smem:[#allocation44_spill]] %s6712_s20  ;;  %s409_s24 = sshll.u32 %s5196_s23, 4  ;;  %s5368_s24 = int_to_ptr.vmem [resolvable:$true] %s409_s24 }
  0x2a   : > { %p5364_p5 = pnand %p4033_p4, %p6659_p1  ;;  %s5197_s15 = smov [#allocation15]  }
  0x2b   : > { %s5370_s14 = sshll.u32 %s5197_s15, 4  ;;  %s6715_s1 = sld [smem:[#allocation51_spill]]  ;;  %s434_s14 = int_to_ptr.vmem [resolvable:$true] %s5370_s14 }
  0x2c   : > { %s6714_s13 = scalar_select %p5364_p5, 1, 0 }
  0x2d   : > { %p5380_p7 = pneg %p5364_p5 }
  0x2f   : > { %s6716_s23 = scalar_select %p5380_p7, 1, 0 }
  0x31   : > { %s4471_s21 = scalar_lea.hbm %s6715_s1, 16 }
  0x32   : > { %p4472_p6 = scmp.ne.s32.totalorder %s6715_s1, %s4471_s21  ;;  %p4478_p10 = scmp.lt.u32.totalorder %s4471_s21, %s6715_s1 }
  0x34   : > { %p4474_p8 = pnand %p5380_p7, %p4472_p6 }
  0x36   : > { %p4475_p9 = pneg %p4474_p8 }
  0x38   : > { %p4480_p11 = pnand %p4478_p10, %p4475_p9 }
  0x3a   : > { %4483 = shalt.err (!%p4480_p11)
}
  0x3b   : > { %s4484_s10 = scalar_lea.vmem %s389_s22, 16  ;;  %s4491_s0 = scalar_lea.vmem %s389_s22, 32 }
  0x3c   : > { %p4485_p12 = scmp.ne.s32.totalorder %s389_s22, %s4484_s10  ;;  %p4492_p2 = scmp.lt.s32.totalorder %s389_s22, %s389_s22 }
  0x3d   : > { %p4493_p4 = scmp.lt.s32.totalorder %s4491_s0, %s4484_s10 }
  0x3e   : > { %p4487_p13 = pnand %p4485_p12, %p5380_p7 }
  0x3f   : > { %p4494_p1 = por %p4493_p4, %p4492_p2 }
  0x40   : > { %p4488_p0 = pneg %p4487_p13 }
  0x42   : > { %p4495_p3 = pnand %p4494_p1, %p4488_p0 }
  0x44   : > { %4498 = shalt.err (!%p4495_p3)
}
  0x45   : > { %4036 = dma.hbm_to_vmem [thread:$0]  (!%p5364_p5), %s6715_s1, 16, %s389_s22, [#allocation10]  }
  0x46   : > { %s6717_s3 = sld [smem:[#allocation53_spill]] }
  0x4c   : > { %s4499_s15 = scalar_lea.hbm %s6717_s3, 2048 }
  0x4d   : > { %p4500_p6 = scmp.ne.s32.totalorder %s6717_s3, %s4499_s15  ;;  %p4506_p1 = scmp.lt.u32.totalorder %s4499_s15, %s6717_s3 }
  0x4f   : > { %p4502_p8 = pnand %p4500_p6, %p5380_p7 }
  0x51   : > { %p4503_p9 = pneg %p4502_p8 }
  0x53   : > { %p4508_p3 = pnand %p4506_p1, %p4503_p9 }
  0x55   : > { %4511 = shalt.err (!%p4508_p3)
}
  0x56   : > { %s4512_s22 = scalar_lea.vmem %s5368_s24, 2048  ;;  %p4520_p13 = scmp.lt.s32.totalorder %s5368_s24, %s5368_s24 }
  0x57   : > { %p4513_p10 = scmp.ne.s32.totalorder %s5368_s24, %s4512_s22  ;;  %p4521_p0 = scmp.lt.s32.totalorder %s4512_s22, %s4512_s22 }
  0x59   : > { %p4515_p11 = pnand %p4513_p10, %p5380_p7  ;;  %p4522_p2 = por %p4521_p0, %p4520_p13 }
  0x5b   : > { %p4516_p12 = pneg %p4515_p11 }
  0x5d   : > { %p4523_p4 = pnand %p4522_p2, %p4516_p12 }
  0x5f   : > { %4526 = shalt.err (!%p4523_p4)
}
  0x60   : > { %s6663_s29 = smov 256   ;;  %s5199_s30 = smov 16  }
  0x61   : > { %4042 = dma.hbm_to_vmem [thread:$0]  (!%p5364_p5), %s6717_s3, 2048, %s5368_s24, [#allocation13], %s6663_s29, %s6663_s29, %s5199_s30  }
  0x62   : > { %s6718_s5 = sld [smem:[#allocation55_spill]] }
  0x68   : > { %s4527_s15 = scalar_lea.hbm %s6718_s5, 1024 }
  0x69   : > { %p4528_p6 = scmp.ne.s32.totalorder %s6718_s5, %s4527_s15  ;;  %p4534_p1 = scmp.lt.u32.totalorder %s4527_s15, %s6718_s5 }
  0x6b   : > { %p4530_p8 = pnand %p4528_p6, %p5380_p7 }
  0x6d   : > { %p4531_p9 = pneg %p4530_p8 }
  0x6f   : > { %p4536_p3 = pnand %p4534_p1, %p4531_p9 }
  0x71   : > { %4539 = shalt.err (!%p4536_p3)
}
  0x72   : > { %s4540_s11 = scalar_lea.vmem %s434_s14, 1024  ;;  %p4548_p13 = scmp.lt.s32.totalorder %s434_s14, %s434_s14 }
  0x73   : > { %p4541_p10 = scmp.ne.s32.totalorder %s434_s14, %s4540_s11  ;;  %p4549_p0 = scmp.lt.s32.totalorder %s4540_s11, %s4540_s11 }
  0x75   : > { %p4543_p11 = pnand %p4541_p10, %p5380_p7  ;;  %p4550_p2 = por %p4549_p0, %p4548_p13 }
  0x77   : > { %p4544_p12 = pneg %p4543_p11 }
  0x79   : > { %p4551_p4 = pnand %p4550_p2, %p4544_p12 }
  0x7b   : > { %4554 = shalt.err (!%p4551_p4)
}
  0x7c   : > { %s6678_s24 = smov 128   ;;  %s6680_s30 = smov 8  }
  0x7d   : > { %4048 = dma.hbm_to_vmem [thread:$0]  (!%p5364_p5), %s6718_s5, 1024, %s434_s14, [#allocation16], %s6678_s24, %s6678_s24, %s6680_s30  }
  0x7e   : > { %s5202_s28 = smov [#allocation18]   ;;  %s5203_s15 = smov [#allocation26]  }
  0x7f   : > { %s458_s21 = sshll.u32 %s5202_s28, 4  ;;  %s480_s10 = sshll.u32 %s5203_s15, 4  ;;  %s459_s21 = int_to_ptr.vmem [resolvable:$true] %s458_s21  ;;  %s481_s10 = int_to_ptr.vmem [resolvable:$true] %s480_s10 }
  0x80   : > { %s6719_s7 = sld [smem:[#allocation57_spill]] }
  0x86   : > { %s4555_s11 = scalar_lea.hbm %s6719_s7, 16 }
  0x87   : > { %p4556_p6 = scmp.ne.s32.totalorder %s6719_s7, %s4555_s11  ;;  %p4562_p1 = scmp.lt.u32.totalorder %s4555_s11, %s6719_s7 }
  0x89   : > { %p4558_p8 = pnand %p4556_p6, %p5380_p7 }
  0x8b   : > { %p4559_p9 = pneg %p4558_p8 }
  0x8d   : > { %p4564_p3 = pnand %p4562_p1, %p4559_p9 }
  0x8f   : > { %4567 = shalt.err (!%p4564_p3)
}
  0x90   : > { %s4568_s14 = scalar_lea.vmem %s459_s21, 16  ;;  %s4575_s1 = scalar_lea.vmem %s459_s21, 32 }
  0x91   : > { %p4569_p10 = scmp.ne.s32.totalorder %s459_s21, %s4568_s14  ;;  %p4576_p13 = scmp.lt.s32.totalorder %s459_s21, %s459_s21 }
  0x92   : > { %p4577_p0 = scmp.lt.s32.totalorder %s4575_s1, %s4568_s14 }
  0x93   : > { %p4571_p11 = pnand %p4569_p10, %p5380_p7 }
  0x94   : > { %p4578_p2 = por %p4577_p0, %p4576_p13 }
  0x95   : > { %p4572_p12 = pneg %p4571_p11 }
  0x97   : > { %p4579_p4 = pnand %p4578_p2, %p4572_p12 }
  0x99   : > { %4582 = shalt.err (!%p4579_p4)
}
  0x9a   : > { %4054 = dma.hbm_to_vmem [thread:$0]  (!%p5364_p5), %s6719_s7, 16, %s459_s21, [#allocation19]  }
  0x9b   : > { %s6720_s12 = sld [smem:[#allocation62_spill]] }
  0xa1   : > { %s4583_s20 = scalar_lea.hbm %s6720_s12, 16 }
  0xa2   : > { %p4584_p6 = scmp.ne.s32.totalorder %s6720_s12, %s4583_s20  ;;  %p4590_p1 = scmp.lt.u32.totalorder %s4583_s20, %s6720_s12 }
  0xa4   : > { %p4586_p8 = pnand %p4584_p6, %p5380_p7 }
  0xa6   : > { %p4587_p9 = pneg %p4586_p8 }
  0xa8   : > { %p4592_p3 = pnand %p4590_p1, %p4587_p9 }
  0xaa   : > { %4595 = shalt.err (!%p4592_p3)
}
  0xab   : > { %s4596_s11 = scalar_lea.vmem %s481_s10, 16  ;;  %s4603_s21 = scalar_lea.vmem %s481_s10, 32 }
  0xac   : > { %p4597_p10 = scmp.ne.s32.totalorder %s481_s10, %s4596_s11  ;;  %p4604_p13 = scmp.lt.s32.totalorder %s481_s10, %s481_s10 }
  0xad   : > { %p4605_p0 = scmp.lt.s32.totalorder %s4603_s21, %s4596_s11 }
  0xae   : > { %p4599_p11 = pnand %p4597_p10, %p5380_p7 }
  0xaf   : > { %p4606_p2 = por %p4605_p0, %p4604_p13 }
  0xb0   : > { %p4600_p12 = pneg %p4599_p11 }
  0xb2   : > { %p4607_p4 = pnand %p4606_p2, %p4600_p12 }
  0xb4   : > { %4610 = shalt.err (!%p4607_p4)
}
  0xb5   : > { %4060 = dma.hbm_to_vmem [thread:$0]  (!%p5364_p5), %s6720_s12, 16, %s481_s10, [#allocation25]  }
  0xb6   : > { %p6667_p6 = scmp.eq.s32.totalorder %s5093_s18, 0  ;;  %p259_p8 = scmp.ne.s32.totalorder %s5061_s27, %s5057_s26 }
  0xb7   : > { %p265_p9 = scmp.ne.s32.totalorder %s5057_s26, %s5053_s25  ;;  %p6666_p1 = scmp.lt.s32.totalorder %s5093_s18, 4 }
  0xb8   : > { %p261_p3 = por %p259_p8, %p6667_p6  ;;  %s6668_s29 = sand.u32 1, %s5093_s18  }
  0xb9   : > { %p6721_p10 = scmp.eq.s32.totalorder %s5351_s19, 0  ;;  %s5496_s17 = sand.u32 1, %s5061_s27  }
  0xba   : > { %s3645_s20 = sshll.u32 %s5085_s16, 7  ;;  %s3644_s28 = sshll.u32 %s5496_s17, 6 }
  0xbb   : > { %p5491_p11 = por %p265_p9, %p6721_p10  ;;  %s6723_s9 = sld [smem:[#allocation59_spill]] }
  0xbc   : > { %p5507_p12 = pnand %p6666_p1, %p261_p3  ;;  %s516_s22 = scalar_lea.vmem [#allocation21], %s3644_s28 }
  0xbd   : > { %s6722_s8 = scalar_select %p5491_p11, 1, 0 }
  0xbe   : > { %s6724_s25 = scalar_select %p5507_p12, 1, 0 }
  0xbf   : > { %s522_s11 = sshll.u32 %s516_s22, 4  ;;  %s5515_s21 = scalar_lea.sflag [#allocation22], %s6668_s29  ;;  %s5511_s11 = int_to_ptr.vmem [resolvable:$true] %s522_s11 }
  0xc0   : > { %p5521_p0 = pneg %p5507_p12 }
  0xc1   : > { %s5503_s0 = scalar_lea.hbm %s6723_s9, %s3645_s20  ;;  %s4616_s28 = scalar_lea.hbm %s6723_s9, 2048 }
  0xc2   : > { %s4611_s14 = scalar_lea.hbm %s5503_s0, 1024  ;;  %p4617_p8 = scmp.lt.u32.totalorder %s5503_s0, %s6723_s9 }
  0xc3   : > { %p4612_p13 = scmp.ne.s32.totalorder %s5503_s0, %s4611_s14  ;;  %p4618_p9 = scmp.lt.u32.totalorder %s4616_s28, %s4611_s14 }
  0xc4   : > { %s6725_s1 = scalar_select %p5521_p0, 1, 0 }
  0xc5   : > { %p4614_p2 = pnand %p5521_p0, %p4612_p13  ;;  %p4619_p3 = por %p4618_p9, %p4617_p8 }
  0xc6   : > { %p4620_p10 = scmp.lt.u32.totalorder %s4611_s14, %s5503_s0 }
  0xc7   : > { %p4615_p4 = pneg %p4614_p2 }
  0xc8   : > { %p4621_p1 = por %p4620_p10, %p4619_p3 }
  0xca   : > { %p4622_p6 = pnand %p4621_p1, %p4615_p4 }
  0xcc   : > { %4625 = shalt.err (!%p4622_p6)
}
  0xcd   : > { %s4626_s29 = scalar_lea.vmem %s5511_s11, 1024  ;;  %s5204_s20 = smov [#allocation21]  }
  0xce   : > { %p4627_p13 = scmp.ne.s32.totalorder %s5511_s11, %s4626_s29  ;;  %s4631_s10 = sshll.u32 %s5204_s20, 4  ;;  %s4632_s10 = int_to_ptr.vmem [resolvable:$false] %s4631_s10 }
  0xcf   : > { %s4633_s15 = scalar_lea.vmem %s4632_s10, 2048  ;;  %p4634_p5 = scmp.lt.s32.totalorder %s5511_s11, %s4632_s10 }
  0xd0   : > { %p4629_p2 = pnand %p4627_p13, %p5521_p0  ;;  %p4635_p7 = scmp.lt.s32.totalorder %s4633_s15, %s4626_s29 }
  0xd2   : > { %p4630_p11 = pneg %p4629_p2  ;;  %p4636_p8 = por %p4635_p7, %p4634_p5 }
  0xd4   : > { %p4637_p9 = pnand %p4636_p8, %p4630_p11 }
  0xd6   : > { %4640 = shalt.err (!%p4637_p9)
}
  0xd7   : > { %s6726_s14 = smov 256   ;;  %s5205_s28 = smov [#allocation11]  }
  0xd8   : > { %4067 = dma.hbm_to_vmem [thread:$0]  (!%p5507_p12), %s5503_s0, 1024, %s5511_s11, %s5515_s21, %s6726_s14, %s6678_s24, %s6680_s30  }
  0xd9   : > { %s399_s22 = sshll.u32 %s5205_s28, 4  ;;  %s5206_s20 = smov [#allocation14]   ;;  %s400_s22 = int_to_ptr.vmem [resolvable:$true] %s399_s22 }
  0xda   : > { %s423_s3 = sshll.u32 %s5206_s20, 4  ;;  %s6727_s2 = sld [smem:[#allocation52_spill]]  ;;  %s424_s3 = int_to_ptr.vmem [resolvable:$true] %s423_s3 }
  0xdb   : > { %p6728_p7 = scmp.ne.s32.totalorder %s6716_s23, 0 }
  0xe0   : > { %s4641_s15 = scalar_lea.hbm %s6727_s2, 16 }
  0xe1   : > { %p4642_p5 = scmp.ne.s32.totalorder %s6727_s2, %s4641_s15  ;;  %p4648_p11 = scmp.lt.u32.totalorder %s4641_s15, %s6727_s2 }
  0xe3   : > { %p4644_p6 = pnand %p4642_p5, %p6728_p7 }
  0xe5   : > { %p4645_p1 = pneg %p4644_p6 }
  0xe7   : > { %p4650_p4 = pnand %p4648_p11, %p4645_p1 }
  0xe9   : > { %4653 = shalt.err (!%p4650_p4)
}
  0xea   : > { %s4654_s0 = scalar_lea.vmem %s400_s22, 16  ;;  %s4661_s11 = scalar_lea.vmem %s400_s22, 32 }
  0xeb   : > { %p4655_p3 = scmp.ne.s32.totalorder %s400_s22, %s4654_s0  ;;  %p4662_p2 = scmp.lt.s32.totalorder %s400_s22, %s400_s22 }
  0xec   : > { %p4663_p8 = scmp.lt.s32.totalorder %s4661_s11, %s4654_s0 }
  0xed   : > { %p4657_p10 = pnand %p4655_p3, %p6728_p7 }
  0xee   : > { %p4664_p9 = por %p4663_p8, %p4662_p2 }
  0xef   : > { %p4658_p13 = pneg %p4657_p10 }
  0xf1   : > { %p4665_p12 = pnand %p4664_p9, %p4658_p13 }
  0xf3   : > { %4668 = shalt.err (!%p4665_p12)
}
  0xf4   : > { %p6729_p5 = scmp.ne.s32.totalorder %s6714_s13, 0  ;;  %s6730_s4 = sld [smem:[#allocation54_spill]] }
  0xf6   : > { %4039 = dma.hbm_to_vmem [thread:$0]  (!%p6729_p5), %s6727_s2, 16, %s400_s22, [#allocation10]  }
  0xfa   : > { %s4669_s14 = scalar_lea.hbm %s6730_s4, 32 }
  0xfb   : > { %p4670_p6 = scmp.ne.s32.totalorder %s6730_s4, %s4669_s14  ;;  %p4676_p12 = scmp.lt.u32.totalorder %s4669_s14, %s6730_s4 }
  0xfd   : > { %p4672_p1 = pnand %p4670_p6, %p6728_p7 }
  0xff   : > { %p4673_p11 = pneg %p4672_p1 }
 0x101   : > { %p4678_p4 = pnand %p4676_p12, %p4673_p11 }
 0x103   : > { %4681 = shalt.err (!%p4678_p4)
}
 0x104   : > { %s4682_s15 = scalar_lea.vmem %s424_s3, 32  ;;  %p4690_p2 = scmp.lt.s32.totalorder %s424_s3, %s424_s3 }
 0x105   : > { %p4683_p3 = scmp.ne.s32.totalorder %s424_s3, %s4682_s15  ;;  %p4691_p8 = scmp.lt.s32.totalorder %s4682_s15, %s4682_s15 }
 0x107   : > { %p4685_p10 = pnand %p4683_p3, %p6728_p7  ;;  %p4692_p9 = por %p4691_p8, %p4690_p2 }
 0x109   : > { %p4686_p13 = pneg %p4685_p10 }
 0x10b   : > { %p4693_p0 = pnand %p4692_p9, %p4686_p13 }
 0x10d   : > { %4696 = shalt.err (!%p4693_p0)
}
 0x10e   : > { %4045 = dma.hbm_to_vmem [thread:$0]  (!%p6729_p5), %s6730_s4, 32, %s424_s3, [#allocation13]  }
 0x10f   : > { %s5207_s11 = smov [#allocation17]   ;;  %s5208_s7 = smov [#allocation20]  }
 0x110   : > { %s447_s5 = sshll.u32 %s5207_s11, 4  ;;  %s469_s9 = sshll.u32 %s5208_s7, 4  ;;  %s448_s5 = int_to_ptr.vmem [resolvable:$true] %s447_s5  ;;  %s470_s9 = int_to_ptr.vmem [resolvable:$true] %s469_s9 }
 0x111   : > { %s6731_s6 = sld [smem:[#allocation56_spill]] }
 0x117   : > { %s4697_s28 = scalar_lea.hbm %s6731_s6, 16 }
 0x118   : > { %p4698_p0 = scmp.ne.s32.totalorder %s6731_s6, %s4697_s28  ;;  %p4704_p11 = scmp.lt.u32.totalorder %s4697_s28, %s6731_s6 }
 0x11a   : > { %p4700_p6 = pnand %p4698_p0, %p6728_p7 }
 0x11c   : > { %p4701_p1 = pneg %p4700_p6 }
 0x11e   : > { %p4706_p12 = pnand %p4704_p11, %p4701_p1 }
 0x120   : > { %4709 = shalt.err (!%p4706_p12)
}
 0x121   : > { %s4710_s3 = scalar_lea.vmem %s448_s5, 16  ;;  %s4717_s22 = scalar_lea.vmem %s448_s5, 32 }
 0x122   : > { %p4711_p4 = scmp.ne.s32.totalorder %s448_s5, %s4710_s3  ;;  %p4718_p13 = scmp.lt.s32.totalorder %s448_s5, %s448_s5 }
 0x123   : > { %p4719_p2 = scmp.lt.s32.totalorder %s4717_s22, %s4710_s3 }
 0x124   : > { %p4713_p3 = pnand %p4711_p4, %p6728_p7 }
 0x125   : > { %p4720_p8 = por %p4719_p2, %p4718_p13 }
 0x126   : > { %p4714_p10 = pneg %p4713_p3 }
 0x128   : > { %p4721_p9 = pnand %p4720_p8, %p4714_p10 }
 0x12a   : > { %4724 = shalt.err (!%p4721_p9)
}
 0x12b   : > { %4051 = dma.hbm_to_vmem [thread:$0]  (!%p6729_p5), %s6731_s6, 16, %s448_s5, [#allocation16]  }
 0x12c   : > { %s6732_s14 = sld [smem:[#allocation58_spill]] }
 0x132   : > { %s6733_s20 = smov %s6732_s14  ;;  %s4725_s28 = scalar_lea.hbm %s6732_s14, 16 }
 0x133   : > { %p4726_p0 = scmp.ne.s32.totalorder %s6733_s20, %s4725_s28  ;;  %p4732_p11 = scmp.lt.u32.totalorder %s4725_s28, %s6733_s20 }
 0x135   : > { %p4728_p6 = pnand %p4726_p0, %p6728_p7 }
 0x137   : > { %p4729_p1 = pneg %p4728_p6 }
 0x139   : > { %p4734_p12 = pnand %p4732_p11, %p4729_p1 }
 0x13b   : > { %4737 = shalt.err (!%p4734_p12)
}
 0x13c   : > { %s4738_s22 = scalar_lea.vmem %s470_s9, 16  ;;  %s4745_s5 = scalar_lea.vmem %s470_s9, 32 }
 0x13d   : > { %p4739_p4 = scmp.ne.s32.totalorder %s470_s9, %s4738_s22  ;;  %p4746_p13 = scmp.lt.s32.totalorder %s470_s9, %s470_s9 }
 0x13e   : > { %p4747_p2 = scmp.lt.s32.totalorder %s4745_s5, %s4738_s22 }
 0x13f   : > { %p4741_p3 = pnand %p4739_p4, %p6728_p7 }
 0x140   : > { %p4748_p8 = por %p4747_p2, %p4746_p13 }
 0x141   : > { %p4742_p10 = pneg %p4741_p3 }
 0x143   : > { %p4749_p9 = pnand %p4748_p8, %p4742_p10 }
 0x145   : > { %4752 = shalt.err (!%p4749_p9)
}
 0x146   : > { %s6734_s7 = sld [smem:[#allocation43_spill]]  ;;  %s6735_s12 = sld [smem:[#allocation40_spill]] }
 0x147   : > { %s6736_s14 = sld [smem:[#allocation39_spill]]  ;;  %s6737_s23 = sld [smem:[#allocation38_spill]] }
 0x148   : > { %4057 = dma.hbm_to_vmem [thread:$0]  (!%p6729_p5), %s6733_s20, 16, %s470_s9, [#allocation19]  }
 0x149   : > { %s3629_s13 = sadd.s32 4294967294, %s5093_s18   ;;  %s48_s28 = sadd.s32 1, %s5085_s16 }
 0x14a   : > { %p49_p7 = scmp.ge.s32.totalorder %s48_s28, 2  ;;  %p6739_p5 = scmp.eq.s32.totalorder %s5093_s18, 0 }
 0x14b   : > { %p6741_p11 = scmp.eq.s32.totalorder %s5351_s19, 0  ;;  %p362_p10 = scmp.eq.s32.totalorder %s5351_s19, 3 }
 0x14c   : > { %s51_s10 = sadd.s32 1, %s6734_s7  ;;  %s58_s29 = sadd.s32 1, %s6735_s12 }
 0x14d   : > { %p65_p0 = scmp.ne.s32.totalorder %s6735_s12, %s6736_s14  ;;  %p71_p6 = scmp.ne.s32.totalorder %s6736_s14, %s6737_s23 }
 0x14e   : > { %s6845_s28 = smov (%p49_p7, %s48_s28), 0  ;;  %s6847_s10 = smov (!%p49_p7, %s51_s10), %s6734_s7 }
 0x14f   : > { %6738 = sst [smem:[#allocation45_spill]] %s6845_s28  ;;  %p5636_p1 = por %p6739_p5, %p65_p0 }
 0x150   : > { %p5645_p12 = por %p6741_p11, %p71_p6  ;;  %p53_p4 = scmp.ge.s32.totalorder %s6847_s10, 2 }
 0x151   : > { %s249_s3 = ssub.s32 %s5085_s16, %s6845_s28  ;;  %s6744_s22 = sadd.s32 1, %s5061_s27 }
 0x152   : > { %s6742_s15 = scalar_select %p5645_p12, 1, 0 }
 0x153   : > { %p250_p3 = scmp.eq.s32.totalorder %s249_s3, 0  ;;  %s6849_s10 = smov (%p53_p4, %s6847_s10), 0 }
 0x154   : > { %6743 = sst [smem:[#allocation46_spill]] %s6849_s10  ;;  %s55_s0 = ssub.s32 %s6734_s7, %s6849_s10 }
 0x155   : > { %s5657_s5 = scalar_select %p250_p3, %s5061_s27, %s6744_s22  }
 0x156   : > { %p5664_p13 = por %p362_p10, %p65_p0  ;;  %p56_p2 = scmp.eq.s32.totalorder %s55_s0, 0 }
 0x157   : > { %6745 = sst [smem:[#allocation47_spill]] %s5657_s5  ;;  %p368_p8 = scmp.eq.s32.totalorder %s3629_s13, 3 }
 0x158   : > { %s6746_s11 = scalar_select %p5664_p13, 1, 0 }
 0x159   : > { %s491_s24 = sand.u32 1, %s6735_s12   ;;  %s3721_s30 = sshll.u32 %s6734_s7, 8 }
 0x15a   : > { %s6851_s12 = smov (!%p56_p2, %s6735_s12), %s58_s29  ;;  %p5676_p9 = por %p368_p8, %p71_p6 }
 0x15b   : > { %6747 = sst [smem:[#allocation48_spill]] %s6851_s12  ;;  %s3641_s2 = sshll.u32 %s491_s24, 4 }
 0x15c   : > { %s6748_s3 = scalar_select %p5676_p9, 1, 0 }
 0x15d   : > { %s6749_s6 = sld [smem:[#allocation50_spill]]  ;;  %p6750_p7 = scmp.lt.s32.totalorder %s5093_s18, 4 }
 0x15e   : > { %s495_s14 = scalar_lea.vmem [#allocation6], %s3641_s2  ;;  %s5695_s13 = scalar_lea.sflag [#allocation7], %s491_s24 }
 0x15f   : > { %p5689_p0 = pnand %p6750_p7, %p5636_p1  ;;  %s502_s23 = sshll.u32 %s495_s14, 4  ;;  %s5693_s23 = int_to_ptr.vmem [resolvable:$true] %s502_s23 }
 0x161   : > { %p4755_p5 = pneg %p5689_p0 }
 0x163   : > { %s5683_s20 = scalar_lea.hbm %s6749_s6, %s3721_s30  ;;  %s4758_s9 = scalar_lea.hbm %s6749_s6, 512 }
 0x164   : > { %s4753_s4 = scalar_lea.hbm %s5683_s20, 256  ;;  %p4759_p1 = scmp.lt.u32.totalorder %s5683_s20, %s6749_s6 }
 0x165   : > { %p4754_p6 = scmp.ne.s32.totalorder %s5683_s20, %s4753_s4  ;;  %p4760_p3 = scmp.lt.u32.totalorder %s4758_s9, %s4753_s4 }
 0x166   : > { %p4762_p2 = scmp.lt.u32.totalorder %s4753_s4, %s5683_s20 }
 0x167   : > { %p4756_p11 = pnand %p4755_p5, %p4754_p6  ;;  %p4761_p10 = por %p4760_p3, %p4759_p1 }
 0x169   : > { %p4757_p4 = pneg %p4756_p11  ;;  %p4763_p8 = por %p4762_p2, %p4761_p10 }
 0x16b   : > { %p4764_p7 = pnand %p4763_p8, %p4757_p4 }
 0x16d   : > { %4767 = shalt.err (!%p4764_p7)
}
 0x16e   : > { %s4768_s2 = scalar_lea.vmem %s5693_s23, 256  ;;  %s5209_s24 = smov [#allocation6]  }
 0x16f   : > { %p4769_p6 = scmp.ne.s32.totalorder %s5693_s23, %s4768_s2  ;;  %s4773_s14 = sshll.u32 %s5209_s24, 4  ;;  %s4774_s14 = int_to_ptr.vmem [resolvable:$false] %s4773_s14 }
 0x170   : > { %s4775_s30 = scalar_lea.vmem %s4774_s14, 512  ;;  %p4776_p13 = scmp.lt.s32.totalorder %s5693_s23, %s4774_s14 }
 0x171   : > { %p4771_p11 = pnand %p4769_p6, %p4755_p5  ;;  %p4777_p1 = scmp.lt.s32.totalorder %s4775_s30, %s4768_s2 }
 0x173   : > { %p4772_p9 = pneg %p4771_p11  ;;  %p4778_p3 = por %p4777_p1, %p4776_p13 }
 0x175   : > { %p4779_p10 = pnand %p4778_p3, %p4772_p9 }
 0x177   : > { %4782 = shalt.err (!%p4779_p10)
}
 0x178   : > { %s6752_s4 = smov 8   ;;  %s6753_s29 = smov 128  }
 0x179   : > { %4064 = dma.hbm_to_vmem [thread:$0]  (!%p5689_p0), %s5683_s20, 256, %s5693_s23, %s5695_s13, %s6753_s29, %s6753_s29, %s6752_s4  }
 0x17a   : > { %s3646_s9 = sshll.u32 %s5085_s16, 4  ;;  %s535_s0 = scalar_lea.vmem [#allocation23], %s5496_s17 }
 0x17b   : > { %s542_s22 = sshll.u32 %s535_s0, 4  ;;  %s6754_s14 = sld [smem:[#allocation60_spill]]  ;;  %s543_s22 = int_to_ptr.vmem [resolvable:$true] %s542_s22 }
 0x17c   : > { %p6756_p9 = scmp.ne.s32.totalorder %s6725_s1, 0 }
 0x181   : > { %s6755_s6 = smov %s6754_s14  ;;  %s540_s30 = scalar_lea.hbm %s6754_s14, %s3646_s9 }
 0x182   : > { %s4783_s10 = scalar_lea.hbm %s540_s30, 16  ;;  %s4788_s12 = scalar_lea.hbm %s6755_s6, 32 }
 0x183   : > { %p4784_p13 = scmp.ne.s32.totalorder %s540_s30, %s4783_s10  ;;  %p4789_p0 = scmp.lt.u32.totalorder %s540_s30, %s6755_s6 }
 0x184   : > { %p4790_p2 = scmp.lt.u32.totalorder %s4788_s12, %s4783_s10  ;;  %p4792_p7 = scmp.lt.u32.totalorder %s4783_s10, %s540_s30 }
 0x185   : > { %p4786_p5 = pnand %p4784_p13, %p6756_p9 }
 0x186   : > { %p4791_p8 = por %p4790_p2, %p4789_p0 }
 0x187   : > { %p4787_p4 = pneg %p4786_p5 }
 0x188   : > { %p4793_p6 = por %p4792_p7, %p4791_p8 }
 0x18a   : > { %p4794_p11 = pnand %p4793_p6, %p4787_p4 }
 0x18c   : > { %4797 = shalt.err (!%p4794_p11)
}
 0x18d   : > { %s4798_s20 = scalar_lea.vmem %s543_s22, 16  ;;  %s5210_s23 = smov [#allocation23]  }
 0x18e   : > { %p4799_p1 = scmp.ne.s32.totalorder %s543_s22, %s4798_s20  ;;  %s4803_s13 = sshll.u32 %s5210_s23, 4  ;;  %s4804_s13 = int_to_ptr.vmem [resolvable:$false] %s4803_s13 }
 0x18f   : > { %s4805_s28 = scalar_lea.vmem %s4804_s13, 32  ;;  %p4806_p13 = scmp.lt.s32.totalorder %s543_s22, %s4804_s13 }
 0x190   : > { %p4801_p3 = pnand %p4799_p1, %p6756_p9  ;;  %p4807_p5 = scmp.lt.s32.totalorder %s4805_s28, %s4798_s20 }
 0x192   : > { %p4802_p10 = pneg %p4801_p3  ;;  %p4808_p12 = por %p4807_p5, %p4806_p13 }
 0x194   : > { %p4809_p0 = pnand %p4808_p12, %p4802_p10 }
 0x196   : > { %4812 = shalt.err (!%p4809_p0)
}
 0x197   : > { %p6757_p2 = scmp.ne.s32.totalorder %s6724_s25, 0  ;;  %s3647_s27 = sshll.u32 %s5496_s17, 7 }
 0x198   : > { %s3722_s12 = sshll.u32 %s5085_s16, 11  ;;  %s6758_s9 = sld [smem:[#allocation61_spill]] }
 0x199   : > { %4070 = dma.hbm_to_vmem [thread:$0]  (!%p6757_p2), %s540_s30, 16, %s543_s22, %s5515_s21  }
 0x19a   : > { %s553_s24 = scalar_lea.vmem [#allocation24], %s3647_s27  ;;  %s6759_s14 = sand.u32 1, %s5093_s18  }
 0x19b   : > { %s560_s2 = sshll.u32 %s553_s24, 4  ;;  %s5755_s7 = scalar_lea.sflag [#allocation25], %s6759_s14  ;;  %s5751_s2 = int_to_ptr.vmem [resolvable:$true] %s560_s2 }
 0x19e   : > { %s5749_s0 = scalar_lea.hbm %s6758_s9, %s3722_s12  ;;  %s4818_s22 = scalar_lea.hbm %s6758_s9, 4096 }
 0x19f   : > { %s4813_s20 = scalar_lea.hbm %s5749_s0, 2048  ;;  %p4819_p7 = scmp.lt.u32.totalorder %s5749_s0, %s6758_s9 }
 0x1a0   : > { %p4814_p12 = scmp.ne.s32.totalorder %s5749_s0, %s4813_s20  ;;  %p4820_p6 = scmp.lt.u32.totalorder %s4818_s22, %s4813_s20 }
 0x1a1   : > { %p4822_p1 = scmp.lt.u32.totalorder %s4813_s20, %s5749_s0 }
 0x1a2   : > { %p4816_p4 = pnand %p4814_p12, %p6756_p9  ;;  %p4821_p11 = por %p4820_p6, %p4819_p7 }
 0x1a4   : > { %p4817_p8 = pneg %p4816_p4  ;;  %p4823_p3 = por %p4822_p1, %p4821_p11 }
 0x1a6   : > { %p4824_p10 = pnand %p4823_p3, %p4817_p8 }
 0x1a8   : > { %4827 = shalt.err (!%p4824_p10)
}
 0x1a9   : > { %s4828_s13 = scalar_lea.vmem %s5751_s2, 2048  ;;  %s5211_s28 = smov [#allocation24]  }
 0x1aa   : > { %p4829_p13 = scmp.ne.s32.totalorder %s5751_s2, %s4828_s13  ;;  %s4833_s27 = sshll.u32 %s5211_s28, 4  ;;  %s4834_s27 = int_to_ptr.vmem [resolvable:$false] %s4833_s27 }
 0x1ab   : > { %s4835_s12 = scalar_lea.vmem %s4834_s27, 4096  ;;  %p4836_p12 = scmp.lt.s32.totalorder %s5751_s2, %s4834_s27 }
 0x1ac   : > { %p4831_p5 = pnand %p4829_p13, %p6756_p9  ;;  %p4837_p4 = scmp.lt.s32.totalorder %s4835_s12, %s4828_s13 }
 0x1ae   : > { %p4832_p0 = pneg %p4831_p5  ;;  %p4838_p7 = por %p4837_p4, %p4836_p12 }
 0x1b0   : > { %p4839_p6 = pnand %p4838_p7, %p4832_p0 }
 0x1b2   : > { %4842 = shalt.err (!%p4839_p6)
}
 0x1b3   : > { %4073 = dma.hbm_to_vmem [thread:$0]  (!%p6757_p2), %s5749_s0, 2048, %s5751_s2, %s5755_s7, %s6753_s29, %s6753_s29, %s6752_s4  }
 0x1b4   : > { %s6760_s1 = sld [smem:[#allocation44_spill]] }
 0x1ba   : > { %p6761_p9 = scmp.ne.s32.totalorder %s6760_s1, 0 }
 0x1bb   : > { %s6762_s10 = sld [smem:[#allocation39_spill]] (!%p6761_p9)  ;;  %p6763_p8 = scmp.ne.s32.totalorder (!%p6761_p9), %s6742_s15, 0 }
 0x1bc   : > { %572 = sbr.rel (%p6761_p9) target bundleno = 3095 (0xc17), region = 72 }
 0x1c1   : > { %s5785_s5 = sand.u32 (!%p6761_p9), 1, %s6762_s10  }
 0x1c2   : > { %s3651_s24 = sshll.u32 (!%p6761_p9), %s5785_s5, 4  ;;  %s575_s14 = scalar_lea.sflag (!%p6761_p9), [#allocation7], %s5785_s5 }
 0x1c3   : > { %s5789_s20 = scalar_lea.vmem [#allocation6], %s3651_s24 }
 0x1c4   : > { %5016 = dma.done.wait (%p6763_p8), %s575_s14, 256  }
 0x1c5   : > { %5018 = vsyncadd (%p6763_p8), %s575_s14, 4294967040  ;;  %p6764_p2 = scmp.eq.s32.totalorder %s5351_s19, 0 }
 0x1c7   : > { %5020 = dma.done.wait (%p6764_p2), [#allocation10], 32   ;;  %p6765_p11 = pmov %p6764_p2 }
 0x1c8   : > { %p6766_p1 = pmov %p6764_p2 }
 0x1c9   : > { %5022 = vsyncadd (%p6765_p11), [#allocation10], 4294967264 }
 0x1ca   : > { %5024 = dma.done.wait (%p6766_p1), [#allocation13], 2080   ;;  %p6767_p3 = pmov %p6766_p1 }
 0x1cb   : > { %p6768_p10 = pmov %p6766_p1 }
 0x1cc   : > { %5026 = vsyncadd (%p6767_p3), [#allocation13], 4294965216 }
 0x1cd   : > { %5028 = dma.done.wait (%p6768_p10), [#allocation16], 1040   ;;  %p6769_p13 = pmov %p6766_p1 }
 0x1ce   : > { %p6770_p5 = pmov %p6766_p1 }
 0x1cf   : > { %5030 = vsyncadd (%p6769_p13), [#allocation16], 4294966256 }
 0x1d0   : > { %5032 = dma.done.wait (%p6770_p5), [#allocation19], 32   ;;  %p6771_p0 = pmov %p6766_p1 }
 0x1d1   : > { %s615_s25 = sand.u32 1, %s5351_s19   ;;  %s5813_s15 = sand.u32 1, %s5057_s26  }
 0x1d2   : > { %5034 = vsyncadd (%p6771_p0), [#allocation19], 4294967264  ;;  %s3660_s4 = sshll.u32 %s5813_s15, 6  ;;  %s616_s29 = scalar_lea.sflag [#allocation22], %s615_s25 }
 0x1d3   : > { %s5816_s0 = scalar_lea.vmem [#allocation21], %s3660_s4  ;;  %p6772_p12 = scmp.ne.s32.totalorder %s6722_s8, 0 }
 0x1d5   : > { %5036 = dma.done.wait (%p6772_p12), %s616_s29, 1040  }
 0x1d6   : > { %5038 = vsyncadd (%p6772_p12), %s616_s29, 4294966256  ;;  %s3661_s2 = sshll.u32 %s5813_s15, 7  ;;  %s627_s7 = scalar_lea.vmem [#allocation23], %s5813_s15 }
 0x1d7   : > { %s633_s17 = scalar_lea.sflag [#allocation25], %s615_s25  ;;  %s5824_s21 = scalar_lea.vmem [#allocation24], %s3661_s2 }
 0x1d8   : > { %5040 = dma.done.wait (%p6772_p12), %s633_s17, 2048  }
 0x1d9   : > { %5042 = vsyncadd (%p6772_p12), %s633_s17, 4294965248  ;;  %p6773_p4 = pmov %p6771_p0 }
 0x1da   : > { %p6774_p7 = pmov %p6771_p0 }
 0x1db   : > { %5044 = dma.done.wait (%p6773_p4), [#allocation25], 16  }
 0x1dc   : > { %5046 = vsyncadd (%p6774_p7), [#allocation25], 4294967280  ;;  %s5834_s22 = scalar_lea.vmem [#allocation27], %s3651_s24  ;;  %s6775_s30 = sld [smem:[#allocation41_spill]] }
 0x1e2   : > { %p3664_p6 = scmp.ne.s32.totalorder %s6775_s30, 0 }
 0x1e4   : > { %701 = sbr.rel (%p3664_p6) target bundleno = 2589 (0xa1d), region = 128 }
 0x1eb   : > { %v5838_v0 = vld [vmem:[%s5789_s20] sm:$0xff]  ;;  %vm706_vm0 = vcmask 523264   ;;  %v5841_v1 = vld [vmem:[%s5789_s20 + $0x8] sm:$0xff]  ;;  %v5212_v37 = vmov 0.0   ;;  %v768_v55 = vlaneseq  ;;  %s5213_s19 = smov 112   ;;  %s5214_s8 = smov 80  }
 0x1ec   : > { %v707_v2 = vsel %vm706_vm0, %v5838_v0, 0.0  ;;  %v710_v3 = vsel %vm706_vm0, %v5841_v1, 0.0  ;;  %v751_v14 = vld [vmem:[#allocation12 + $0x8] sm:$0xff]  ;;  %v753_v15 = vld [vmem:[#allocation12 + $0x18] sm:$0xff]  ;;  %v750_v17 = vld [vmem:[#allocation12] sm:$0xff]  ;;  %848 = vmatprep.mubr.f32.mxu0 %v5212_v37  ;;  %854 = vmatprep.mubr.f32.mxu1 %v5212_v37  ;;  %s5215_s23 = smov 64  }
 0x1ed   : > { %708 = vadd.xlane.f32.xlu0 %v707_v2  ;;  %v3899_v16 = vpack.c.bf16 %v753_v15, %v751_v14  ;;  %v752_v18 = vld [vmem:[#allocation12 + $0x10] sm:$0xff]  ;;  %v755_v20 = vld [vmem:[#allocation12 + $0x28] sm:$0xff]  ;;  %v757_v21 = vld [vmem:[#allocation12 + $0x38] sm:$0xff]  ;;  %v5863_v56 = vshrl.u32 %v768_v55, 7  ;;  %s5216_s13 = smov 96   ;;  %vm1621_vm1 = vcmask 130048  }
 0x1ee   : > { %v3901_v19 = vpack.c.bf16 %v752_v18, %v750_v17  ;;  %v3903_v22 = vpack.c.bf16 %v757_v21, %v755_v20  ;;  %v754_v23 = vld [vmem:[#allocation12 + $0x20] sm:$0xff]  ;;  %v756_v24 = vld [vmem:[#allocation12 + $0x30] sm:$0xff]  ;;  %v759_v26 = vld [vmem:[#allocation12 + $0x48] sm:$0xff]  ;;  %v5217_v15 = vmov 1983009808   ;;  %s6130_s28 = smov 0  }
 0x1ef   : > { %3900 = vmatprep.subr.bf16.mxu0 %v3899_v16  ;;  %3979 = vmatprep.subr.bf16.mxu1 %v3899_v16  ;;  %v3905_v25 = vpack.c.bf16 %v756_v24, %v754_v23  ;;  %v761_v27 = vld [vmem:[#allocation12 + $0x58] sm:$0xff]  ;;  %v758_v28 = vld [vmem:[#allocation12 + $0x40] sm:$0xff]  ;;  %v760_v30 = vld [vmem:[#allocation12 + $0x50] sm:$0xff]  ;;  %v770_v57 = vsub.s32 0, %v5863_v56  ;;  %v774_v2 = vsub.s32 1, %v5863_v56  ;;  %v886_v16 = vunpack.c.l.s4 %v5217_v15 }
 0x1f0   : > { %3902 = vmatpush1.bf16.msra.mxu0 %v3901_v19  ;;  %3983 = vmatpush1.bf16.msra.mxu1 %v3901_v19  ;;  %v3907_v29 = vpack.c.bf16 %v761_v27, %v759_v26  ;;  %v763_v31 = vld [vmem:[#allocation12 + $0x68] sm:$0xff]  ;;  %v765_v32 = vld [vmem:[#allocation12 + $0x78] sm:$0xff]  ;;  %v3909_v33 = vpack.c.bf16 %v760_v30, %v758_v28  ;;  %v762_v35 = vld [vmem:[#allocation12 + $0x60] sm:$0xff]  ;;  %v5218_v19 = vmov 1934713408  }
 0x1f1   : > { %711 = vadd.xlane.f32.xlu0 %v710_v3  ;;  %3904 = vmatprep.subr.bf16.mxu0 %v3903_v22  ;;  %v3911_v34 = vpack.c.bf16 %v765_v32, %v763_v31  ;;  %v764_v36 = vld [vmem:[#allocation12 + $0x70] sm:$0xff]  ;;  %v3665_v46 = vld [vmem:[#allocation9] ss:$0 sm:$0xff]  ;;  %v3666_v48 = vld [vmem:[#allocation11] ss:$0 sm:$0xff]  ;;  %v918_v20 = vunpack.c.l.s4 %v5218_v19  ;;  %v887_v21 = vunpack.c.0.s8 %v886_v16 }
 0x1f2   : > { %3980 = vmatprep.subr.bf16.mxu1 %v3903_v22  ;;  %v3913_v38 = vpack.c.bf16 %v764_v36, %v762_v35  ;;  %v766_v58 = vld [vmem:[#allocation14] sm:$0x3] }
 0x1f3   : > { %v771_v59 = vrot.slane %v766_v58, %v770_v57  ;;  %v919_v24 = vunpack.c.0.s8 %v918_v20 }
 0x1f4   : > { %3906 = vmatpush1.bf16.msra.mxu0 %v3905_v25  ;;  %3984 = vmatpush1.bf16.msra.mxu1 %v3905_v25  ;;  %v5897_v25 = vsub.s32 %v887_v21, %v5863_v56 }
 0x1f5   : > { %3908 = vmatprep.subr.bf16.mxu0 %v3907_v29  ;;  %3981 = vmatprep.subr.bf16.mxu1 %v3907_v29  ;;  %v5904_v32 = vsub.s32 %v919_v24, %v5863_v56 }
 0x1f8   : > { %3910 = vmatpush1.bf16.msra.mxu0 %v3909_v33  ;;  %3985 = vmatpush1.bf16.msra.mxu1 %v3909_v33 }
 0x1f9   : > { %3912 = vmatprep.subr.bf16.mxu0 %v3911_v34  ;;  %3982 = vmatprep.subr.bf16.mxu1 %v3911_v34 }
 0x1fc   : > { %3914 = vmatpush1.bf16.msra.mxu0 %v3913_v38  ;;  %3986 = vmatpush1.bf16.msra.mxu1 %v3913_v38 }
 0x27a   : > { %v709_v4 = vpop.xlane.xlu0 %708 }
 0x27b   : > { %v714_v5 = vmul.f32 0.015625, %v709_v4 }
 0x27d   : > { %v5848_v6 = vsub.f32 %v5838_v0, %v714_v5  ;;  %v775_v5 = vrot.slane %v766_v58, %v774_v2 }
 0x27e   : > { %v712_v7 = vpop.xlane.xlu0 %711 }
 0x27f   : > { %v715_v8 = vmul.f32 0.015625, %v712_v7  ;;  %v718_v9 = vmul.f32 %v5848_v6, %v5848_v6 }
 0x281   : > { %v5853_v10 = vsub.f32 %v5841_v1, %v715_v8  ;;  %v720_v11 = vsel %vm706_vm0, %v718_v9, 0.0 }
 0x282   : > { %721 = vadd.xlane.f32.xlu1 %v720_v11 }
 0x283   : > { %v719_v12 = vmul.f32 %v5853_v10, %v5853_v10 }
 0x285   : > { %v723_v13 = vsel %vm706_vm0, %v719_v12, 0.0 }
 0x286   : > { %724 = vadd.xlane.f32.xlu1 %v723_v13 }
 0x30f   : > { %v722_v39 = vpop.xlane.xlu1 %721 }
 0x310   : > { %v726_v40 = vmul.f32 0.015625, %v722_v39 }
 0x312   : > { %v728_v41 = vadd.f32 1e-05, %v726_v40 }
 0x313   : > { %v725_v42 = vpop.xlane.xlu1 %724 }
 0x314   : > { %4411 = vrsqrt.f32 %v728_v41  ;;  %v727_v43 = vmul.f32 0.015625, %v725_v42 }
 0x316   : > { %v729_v44 = vadd.f32 1e-05, %v727_v43 }
 0x318   : > { %4413 = vrsqrt.f32 %v729_v44 }
 0x31e   : > { %v4412_v45 = vpop.eup %4411 }
 0x31f   : > { %v732_v47 = vmul.f32 %v4412_v45, %v5848_v6 }
 0x321   : > { %v740_v49 = vmul.f32 %v3665_v46, %v732_v47 }
 0x322   : > { %v4414_v50 = vpop.eup %4413 }
 0x323   : > { %v748_v51 = vadd.f32 %v3666_v48, %v740_v49  ;;  %v733_v52 = vmul.f32 %v4414_v50, %v5853_v10 }
 0x325   : > { %3667 = vmatmul.mubr.msk.f32.vlgmr.msra.gmra.mrb[0].mxu0 %vm706_vm0, %v748_v51  ;;  %v741_v53 = vmul.f32 %v3665_v46, %v733_v52 }
 0x327   : > { %v749_v54 = vadd.f32 %v3666_v48, %v741_v53 }
 0x329   : > { %3668 = vmatmul.mubr.msk.f32.vlgmr.msra.gmra.mrb[0].mxu1 %vm706_vm0, %v749_v54 }
 0x3f8   : > { %v850_v60 = vpop.f32.mrb[0].mxu0 }
 0x3f9   : > { %v851_v61 = vadd.f32 %v850_v60, %v771_v59  ;;  %v852_v62 = vpop.f32.mrb[1].mxu0 }
 0x3fa   : > { %v853_v6 = vadd.f32 %v852_v62, %v775_v5 }
 0x3fb   : > { %1021 = vrot.lane.b32.xlu0 %v851_v61, %s5213_s19  ;;  %v5874_v8 = vmul.f32 0.25, %v851_v61 }
 0x3fc   : > { %v856_v63 = vpop.f32.mrb[0].mxu1 }
 0x3fd   : > { %v857_v3 = vadd.f32 %v856_v63, %v771_v59  ;;  %v858_v4 = vpop.f32.mrb[1].mxu1 }
 0x3fe   : > { %v5872_v7 = vadd.f32 %v858_v4, %v775_v5 }
 0x3ff   : > { %1029 = vrot.lane.b32.xlu0 %v851_v61, %s5214_s8  ;;  %1023 = vrot.lane.b32.xlu1 %v857_v3, %s5213_s19  ;;  %v5882_v9 = vmul.f32 0.25, %v857_v3 }
 0x403   : > { %1033 = vrot.lane.b32.xlu0 %v851_v61, %s5215_s23  ;;  %1025 = vrot.lane.b32.xlu1 %v851_v61, %s5216_s13 }
 0x407   : > { %1195 = vrot.lane.b32.xlu0 %v853_v6, %s5213_s19  ;;  %1027 = vrot.lane.b32.xlu1 %v857_v3, %s5216_s13 }
 0x40b   : > { %1201 = vrot.lane.b32.xlu0 %v853_v6, %s5216_s13  ;;  %1031 = vrot.lane.b32.xlu1 %v857_v3, %s5214_s8 }
 0x40f   : > { %1207 = vrot.lane.b32.xlu0 %v853_v6, %s5214_s8  ;;  %1035 = vrot.lane.b32.xlu1 %v857_v3, %s5215_s23 }
 0x413   : > { %865 = vrot.lane.b32.xlu0 %v5874_v8, %s5213_s19  ;;  %1197 = vrot.lane.b32.xlu1 %v5872_v7, %s5213_s19 }
 0x417   : > { %871 = vrot.lane.b32.xlu0 %v5874_v8, %s5216_s13  ;;  %1203 = vrot.lane.b32.xlu1 %v5872_v7, %s5216_s13 }
 0x41b   : > { %1209 = vrot.lane.b32.xlu1 %v5872_v7, %s5214_s8 }
 0x41f   : > { %867 = vrot.lane.b32.xlu1 %v5882_v9, %s5213_s19 }
 0x423   : > { %873 = vrot.lane.b32.xlu1 %v5882_v9, %s5216_s13 }
 0x46d   : > { %v1022_v10 = vpop.permute.xlu0 %1021 }
 0x46e   : > { %1037 = vrot.lane.b32.xlu0 %v1022_v10, %s5215_s23 }
 0x471   : > { %v1024_v11 = vpop.permute.xlu1 %1023  ;;  %v1030_v12 = vpop.permute.xlu0 %1029 }
 0x472   : > { %1039 = vrot.lane.b32.xlu1 %v1024_v11, %s5215_s23 }
 0x475   : > { %v1026_v13 = vpop.permute.xlu1 %1025  ;;  %v5888_v14 = vpop.permute.xlu0 %1033 }
 0x476   : > { %1041 = vrot.lane.b32.xlu0 %v1026_v13, %s5215_s23 }
 0x479   : > { %v1028_v17 = vpop.permute.xlu1 %1027  ;;  %v1196_v18 = vpop.permute.xlu0 %1195 }
 0x47a   : > { %1043 = vrot.lane.b32.xlu1 %v1028_v17, %s5215_s23  ;;  %1045 = vrot.lane.b32.xlu0 %v1030_v12, %s5215_s23 }
 0x47d   : > { %v1032_v22 = vpop.permute.xlu1 %1031  ;;  %v1202_v23 = vpop.permute.xlu0 %1201 }
 0x47e   : > { %1047 = vrot.lane.b32.xlu1 %v1032_v22, %s5215_s23  ;;  %877 = vrot.lane.b32.xlu0 %v5874_v8, %s5214_s8  ;;  %v1213_v26 = vcombine.low %v853_v6, %v1202_v23  ;;  %v1214_v27 = vcombine.high %v853_v6, %v1202_v23 }
 0x480   : > { %v1221_v33 = vrot.slane %v1213_v26, %v5897_v25  ;;  %v1228_v34 = vrot.slane %v1214_v27, %v5897_v25 }
 0x481   : > { %v5899_v28 = vpop.permute.xlu1 %1035  ;;  %v1208_v29 = vpop.permute.xlu0 %1207 }
 0x482   : > { %v1229_v30 = vcombine.low %v1196_v18, %v1208_v29  ;;  %v1230_v31 = vcombine.high %v1196_v18, %v1208_v29  ;;  %879 = vrot.lane.b32.xlu1 %v5882_v9, %s5214_s8 }
 0x484   : > { %v1237_v35 = vrot.slane %v1229_v30, %v5897_v25  ;;  %v1244_v36 = vrot.slane %v1230_v31, %v5897_v25 }
 0x485   : > { %v1198_v37 = vpop.permute.xlu1 %1197 }
 0x486   : > { %v1245_v38 = vcombine.low %v1221_v33, %v1237_v35  ;;  %v1246_v39 = vcombine.high %v1221_v33, %v1237_v35  ;;  %v1261_v40 = vcombine.low %v1228_v34, %v1244_v36  ;;  %v1262_v41 = vcombine.high %v1228_v34, %v1244_v36 }
 0x488   : > { %v1253_v42 = vrot.slane %v1245_v38, %v5904_v32  ;;  %v1260_v43 = vrot.slane %v1246_v39, %v5904_v32  ;;  %v1269_v44 = vrot.slane %v1261_v40, %v5904_v32  ;;  %v1276_v45 = vrot.slane %v1262_v41, %v5904_v32 }
 0x489   : > { %v1204_v46 = vpop.permute.xlu1 %1203 }
 0x48a   : > { %v1630_v47 = vcombine.low %v1253_v42, %v1260_v43  ;;  %v3677_v48 = vcombine.high %v1253_v42, %v1260_v43  ;;  %v1646_v49 = vcombine.low %v1269_v44, %v1276_v45  ;;  %v3678_v50 = vcombine.high %v1269_v44, %v1276_v45 }
 0x48b   : > { %v1281_v55 = vcombine.low %v5872_v7, %v1204_v46  ;;  %v1282_v56 = vcombine.high %v5872_v7, %v1204_v46 }
 0x48c   : > { %v1637_v51 = vrot.slane %v1630_v47, %v5897_v25  ;;  %v1645_v52 = vrot.slane %v3677_v48, %v5897_v25  ;;  %v1653_v53 = vrot.slane %v1646_v49, %v5897_v25  ;;  %v1661_v54 = vrot.slane %v3678_v50, %v5897_v25  ;;  %v866_v48 = vpop.permute.xlu0 %865 }
 0x48d   : > { %v1210_v57 = vpop.permute.xlu1 %1209  ;;  %v1289_v6 = vrot.slane %v1281_v55, %v5897_v25  ;;  %v1296_v7 = vrot.slane %v1282_v56, %v5897_v25 }
 0x48e   : > { %v1662_v58 = vcombine.low %v1637_v51, %v1645_v52  ;;  %v1663_v59 = vcombine.high %v1637_v51, %v1645_v52  ;;  %v1678_v60 = vcombine.low %v1653_v53, %v1661_v54  ;;  %v1679_v61 = vcombine.high %v1653_v53, %v1661_v54 }
 0x48f   : > { %v1297_v62 = vcombine.low %v1198_v37, %v1210_v57  ;;  %v1298_v63 = vcombine.high %v1198_v37, %v1210_v57 }
 0x490   : > { %v1670_v2 = vrot.slane %v1662_v58, %v5904_v32  ;;  %v1677_v3 = vrot.slane %v1663_v59, %v5904_v32  ;;  %v1686_v4 = vrot.slane %v1678_v60, %v5904_v32  ;;  %v1693_v5 = vrot.slane %v1679_v61, %v5904_v32  ;;  %v872_v50 = vpop.permute.xlu0 %871 }
 0x491   : > { %v1305_v10 = vrot.slane %v1297_v62, %v5897_v25  ;;  %v1312_v11 = vrot.slane %v1298_v63, %v5897_v25  ;;  %v5948_v49 = vpop.permute.xlu1 %867  ;;  %v883_v55 = vcombine.low %v5874_v8, %v872_v50  ;;  %v884_v56 = vcombine.high %v5874_v8, %v872_v50 }
 0x492   : > { %v1694_v12 = vcombine.low %v1670_v2, %v1686_v4  ;;  %v1695_v13 = vcombine.high %v1670_v2, %v1686_v4  ;;  %v1696_v15 = vcombine.low %v1677_v3, %v1693_v5  ;;  %v1697_v16 = vcombine.high %v1677_v3, %v1693_v5 }
 0x493   : > { %v1313_v17 = vcombine.low %v1289_v6, %v1305_v10  ;;  %v1314_v18 = vcombine.high %v1289_v6, %v1305_v10  ;;  %v1329_v19 = vcombine.low %v1296_v7, %v1312_v11  ;;  %v1330_v20 = vcombine.high %v1296_v7, %v1312_v11 }
 0x494   : > { %1766 = vst.msk [vmem:[#allocation5] sm:$0xff] %vm1621_vm1, %v1694_v12  ;;  %1768 = vst.msk [vmem:[#allocation5 + $0x10] sm:$0xff] %vm1621_vm1, %v1695_v13  ;;  %v5959_v3 = vrot.slane %v883_v55, %v5897_v25  ;;  %v5962_v4 = vrot.slane %v884_v56, %v5897_v25 }
 0x495   : > { %1770 = vst.msk [vmem:[#allocation5 + $0x20] sm:$0xff] %vm1621_vm1, %v1696_v15  ;;  %1772 = vst.msk [vmem:[#allocation5 + $0x30] sm:$0xff] %vm1621_vm1, %v1697_v16  ;;  %v1321_v21 = vrot.slane %v1313_v17, %v5904_v32  ;;  %v1328_v22 = vrot.slane %v1314_v18, %v5904_v32  ;;  %v1337_v23 = vrot.slane %v1329_v19, %v5904_v32  ;;  %v5950_v51 = vpop.permute.xlu1 %873 }
 0x496   : > { %v1344_v24 = vrot.slane %v1330_v20, %v5904_v32  ;;  %v951_v7 = vcombine.low %v5882_v9, %v5950_v51 }
 0x497   : > { %v1698_v26 = vcombine.low %v1321_v21, %v1328_v22  ;;  %v3679_v27 = vcombine.high %v1321_v21, %v1328_v22 }
 0x498   : > { %v1714_v29 = vcombine.low %v1337_v23, %v1344_v24  ;;  %v3680_v30 = vcombine.high %v1337_v23, %v1344_v24 }
 0x499   : > { %v1705_v31 = vrot.slane %v1698_v26, %v5897_v25  ;;  %v1713_v33 = vrot.slane %v3679_v27, %v5897_v25 }
 0x49a   : > { %v1721_v34 = vrot.slane %v1714_v29, %v5897_v25  ;;  %v1729_v35 = vrot.slane %v3680_v30, %v5897_v25 }
 0x49b   : > { %v1730_v36 = vcombine.low %v1705_v31, %v1713_v33  ;;  %v1731_v37 = vcombine.high %v1705_v31, %v1713_v33 }
 0x49c   : > { %v1746_v38 = vcombine.low %v1721_v34, %v1729_v35  ;;  %v1747_v39 = vcombine.high %v1721_v34, %v1729_v35 }
 0x49d   : > { %v1738_v40 = vrot.slane %v1730_v36, %v5904_v32  ;;  %v1745_v41 = vrot.slane %v1731_v37, %v5904_v32 }
 0x49e   : > { %v1754_v42 = vrot.slane %v1746_v38, %v5904_v32  ;;  %v1761_v43 = vrot.slane %v1747_v39, %v5904_v32 }
 0x4a0   : > { %v1762_v44 = vcombine.low %v1738_v40, %v1754_v42  ;;  %v1763_v45 = vcombine.high %v1738_v40, %v1754_v42  ;;  %v1764_v46 = vcombine.low %v1745_v41, %v1761_v43  ;;  %v1765_v47 = vcombine.high %v1745_v41, %v1761_v43 }
 0x4a2   : > { %1767 = vst.msk [vmem:[#allocation5 + $0x8] sm:$0xff] %vm1621_vm1, %v1762_v44  ;;  %1769 = vst.msk [vmem:[#allocation5 + $0x18] sm:$0xff] %vm1621_vm1, %v1763_v45 }
 0x4a3   : > { %1771 = vst.msk [vmem:[#allocation5 + $0x28] sm:$0xff] %vm1621_vm1, %v1764_v46  ;;  %1773 = vst.msk [vmem:[#allocation5 + $0x38] sm:$0xff] %vm1621_vm1, %v1765_v47 }
 0x4e0   : > { %v1038_v52 = vpop.permute.xlu0 %1037 }
 0x4e4   : > { %v1040_v53 = vpop.permute.xlu1 %1039 }
 0x4e8   : > { %v1042_v54 = vpop.permute.xlu0 %1041 }
 0x4e9   : > { %v1057_v57 = vcombine.low %v5888_v14, %v1042_v54  ;;  %v1058_v58 = vcombine.high %v5888_v14, %v1042_v54 }
 0x4eb   : > { %v1065_v8 = vrot.slane %v1057_v57, %v5897_v25  ;;  %v1072_v5 = vrot.slane %v1058_v58, %v5897_v25 }
 0x4ec   : > { %v1044_v59 = vpop.permute.xlu1 %1043  ;;  %v1046_v60 = vpop.permute.xlu0 %1045 }
 0x4ed   : > { %v1125_v61 = vcombine.low %v5899_v28, %v1044_v59  ;;  %v1126_v62 = vcombine.high %v5899_v28, %v1044_v59  ;;  %v1073_v63 = vcombine.low %v1038_v52, %v1046_v60  ;;  %v1074_v2 = vcombine.high %v1038_v52, %v1046_v60 }
 0x4ee   : > { %v952_v28 = vcombine.high %v5882_v9, %v5950_v51 }
 0x4ef   : > { %v1081_v14 = vrot.slane %v1073_v63, %v5897_v25  ;;  %v1088_v6 = vrot.slane %v1074_v2, %v5897_v25  ;;  %v1133_v10 = vrot.slane %v1125_v61, %v5897_v25  ;;  %v1140_v11 = vrot.slane %v1126_v62, %v5897_v25 }
 0x4f0   : > { %v1048_v12 = vpop.permute.xlu1 %1047  ;;  %v878_v13 = vpop.permute.xlu0 %877 }
 0x4f1   : > { %v1089_v15 = vcombine.low %v1065_v8, %v1081_v14  ;;  %v1090_v16 = vcombine.high %v1065_v8, %v1081_v14  ;;  %v1105_v17 = vcombine.low %v1072_v5, %v1088_v6  ;;  %v1106_v18 = vcombine.high %v1072_v5, %v1088_v6 }
 0x4f2   : > { %v1141_v19 = vcombine.low %v1040_v53, %v1048_v12  ;;  %v1142_v20 = vcombine.high %v1040_v53, %v1048_v12  ;;  %v899_v21 = vcombine.low %v866_v48, %v878_v13  ;;  %v900_v22 = vcombine.high %v866_v48, %v878_v13 }
 0x4f3   : > { %v1097_v23 = vrot.slane %v1089_v15, %v5904_v32  ;;  %v1104_v24 = vrot.slane %v1090_v16, %v5904_v32  ;;  %v1113_v26 = vrot.slane %v1105_v17, %v5904_v32  ;;  %v1120_v27 = vrot.slane %v1106_v18, %v5904_v32 }
 0x4f4   : > { %v1149_v29 = vrot.slane %v1141_v19, %v5897_v25  ;;  %v1156_v30 = vrot.slane %v1142_v20, %v5897_v25  ;;  %v907_v31 = vrot.slane %v899_v21, %v5897_v25  ;;  %v914_v33 = vrot.slane %v900_v22, %v5897_v25 }
 0x4f5   : > { %v1485_v34 = vcombine.low %v1097_v23, %v1104_v24  ;;  %v3673_v35 = vcombine.high %v1097_v23, %v1104_v24  ;;  %v1501_v36 = vcombine.low %v1113_v26, %v1120_v27  ;;  %v3674_v37 = vcombine.high %v1113_v26, %v1120_v27 }
 0x4f6   : > { %v1157_v38 = vcombine.low %v1133_v10, %v1149_v29  ;;  %v1158_v39 = vcombine.high %v1133_v10, %v1149_v29  ;;  %v1173_v40 = vcombine.low %v1140_v11, %v1156_v30  ;;  %v1174_v41 = vcombine.high %v1140_v11, %v1156_v30 }
 0x4f7   : > { %v1492_v42 = vrot.slane %v1485_v34, %v5897_v25  ;;  %v1500_v43 = vrot.slane %v3673_v35, %v5897_v25  ;;  %v1508_v44 = vrot.slane %v1501_v36, %v5897_v25  ;;  %v1516_v45 = vrot.slane %v3674_v37, %v5897_v25 }
 0x4f8   : > { %v1165_v46 = vrot.slane %v1157_v38, %v5904_v32  ;;  %v1172_v47 = vrot.slane %v1158_v39, %v5904_v32  ;;  %v1181_v48 = vrot.slane %v1173_v40, %v5904_v32  ;;  %v1188_v50 = vrot.slane %v1174_v41, %v5904_v32 }
 0x4f9   : > { %v1517_v52 = vcombine.low %v1492_v42, %v1500_v43  ;;  %v1518_v53 = vcombine.high %v1492_v42, %v1500_v43  ;;  %v1533_v54 = vcombine.low %v1508_v44, %v1516_v45  ;;  %v1534_v55 = vcombine.high %v1508_v44, %v1516_v45 }
 0x4fa   : > { %v1553_v56 = vcombine.low %v1165_v46, %v1172_v47  ;;  %v3675_v57 = vcombine.high %v1165_v46, %v1172_v47  ;;  %v1569_v58 = vcombine.low %v1181_v48, %v1188_v50  ;;  %v3676_v59 = vcombine.high %v1181_v48, %v1188_v50 }
 0x4fb   : > { %v1525_v60 = vrot.slane %v1517_v52, %v5904_v32  ;;  %v1532_v61 = vrot.slane %v1518_v53, %v5904_v32  ;;  %v1541_v62 = vrot.slane %v1533_v54, %v5904_v32  ;;  %v1548_v63 = vrot.slane %v1534_v55, %v5904_v32 }
 0x4fc   : > { %v1560_v2 = vrot.slane %v1553_v56, %v5897_v25  ;;  %v1568_v8 = vrot.slane %v3675_v57, %v5897_v25  ;;  %v1576_v5 = vrot.slane %v1569_v58, %v5897_v25  ;;  %v1584_v14 = vrot.slane %v3676_v59, %v5897_v25 }
 0x4fd   : > { %v1549_v6 = vcombine.low %v1525_v60, %v1541_v62  ;;  %v1550_v10 = vcombine.high %v1525_v60, %v1541_v62  ;;  %v1551_v11 = vcombine.low %v1532_v61, %v1548_v63  ;;  %v1552_v12 = vcombine.high %v1532_v61, %v1548_v63 }
 0x4fe   : > { %v1585_v13 = vcombine.low %v1560_v2, %v1568_v8  ;;  %v1586_v15 = vcombine.high %v1560_v2, %v1568_v8  ;;  %v1601_v16 = vcombine.low %v1576_v5, %v1584_v14  ;;  %v1602_v17 = vcombine.high %v1576_v5, %v1584_v14 }
 0x4ff   : > { %1622 = vst.msk [vmem:[#allocation4] sm:$0xff] %vm1621_vm1, %v1549_v6  ;;  %1624 = vst.msk [vmem:[#allocation4 + $0x10] sm:$0xff] %vm1621_vm1, %v1550_v10  ;;  %v915_v18 = vcombine.low %v5959_v3, %v907_v31  ;;  %v916_v19 = vcombine.high %v5959_v3, %v907_v31  ;;  %v931_v20 = vcombine.low %v5962_v4, %v914_v33  ;;  %v880_v31 = vpop.permute.xlu1 %879 }
 0x500   : > { %1626 = vst.msk [vmem:[#allocation4 + $0x20] sm:$0xff] %vm1621_vm1, %v1551_v11  ;;  %1628 = vst.msk [vmem:[#allocation4 + $0x30] sm:$0xff] %vm1621_vm1, %v1552_v12  ;;  %v932_v21 = vcombine.high %v5962_v4, %v914_v33  ;;  %v1593_v22 = vrot.slane %v1585_v13, %v5904_v32  ;;  %v1600_v23 = vrot.slane %v1586_v15, %v5904_v32 }
 0x501   : > { %v1609_v24 = vrot.slane %v1601_v16, %v5904_v32  ;;  %v1616_v26 = vrot.slane %v1602_v17, %v5904_v32  ;;  %v923_v27 = vrot.slane %v915_v18, %v5904_v32  ;;  %v930_v29 = vrot.slane %v916_v19, %v5904_v32 }
 0x502   : > { %v939_v30 = vrot.slane %v931_v20, %v5904_v32  ;;  %v946_v3 = vrot.slane %v932_v21, %v5904_v32  ;;  %v967_v40 = vcombine.low %v5948_v49, %v880_v31  ;;  %v968_v41 = vcombine.high %v5948_v49, %v880_v31 }
 0x503   : > { %v1617_v34 = vcombine.low %v1593_v22, %v1609_v24  ;;  %v1618_v35 = vcombine.high %v1593_v22, %v1609_v24  ;;  %v1619_v4 = vcombine.low %v1600_v23, %v1616_v26  ;;  %v1620_v33 = vcombine.high %v1600_v23, %v1616_v26 }
 0x504   : > { %v1349_v36 = vcombine.low %v923_v27, %v930_v29  ;;  %v3669_v37 = vcombine.high %v923_v27, %v930_v29  ;;  %v1365_v38 = vcombine.low %v939_v30, %v946_v3  ;;  %v3670_v39 = vcombine.high %v939_v30, %v946_v3 }
 0x505   : > { %1623 = vst.msk [vmem:[#allocation4 + $0x8] sm:$0xff] %vm1621_vm1, %v1617_v34  ;;  %1625 = vst.msk [vmem:[#allocation4 + $0x18] sm:$0xff] %vm1621_vm1, %v1618_v35  ;;  %v959_v46 = vrot.slane %v951_v7, %v5897_v25  ;;  %v966_v47 = vrot.slane %v952_v28, %v5897_v25  ;;  %v975_v49 = vrot.slane %v967_v40, %v5897_v25  ;;  %v6082_v3 = vmov 0.0  }
 0x506   : > { %1627 = vst.msk [vmem:[#allocation4 + $0x28] sm:$0xff] %vm1621_vm1, %v1619_v4  ;;  %1629 = vst.msk [vmem:[#allocation4 + $0x38] sm:$0xff] %vm1621_vm1, %v1620_v33  ;;  %v1356_v42 = vrot.slane %v1349_v36, %v5897_v25  ;;  %v1364_v43 = vrot.slane %v3669_v37, %v5897_v25  ;;  %v1372_v44 = vrot.slane %v1365_v38, %v5897_v25  ;;  %v6084_v31 = vmov 0.0  }
 0x507   : > { %v1380_v45 = vrot.slane %v3670_v39, %v5897_v25  ;;  %v982_v48 = vrot.slane %v968_v41, %v5897_v25  ;;  %v983_v55 = vcombine.low %v959_v46, %v975_v49  ;;  %v984_v56 = vcombine.high %v959_v46, %v975_v49 }
 0x508   : > { %v1381_v50 = vcombine.low %v1356_v42, %v1364_v43  ;;  %v1382_v52 = vcombine.high %v1356_v42, %v1364_v43  ;;  %v6086_v34 = vmov 0.0   ;;  %v6088_v35 = vmov 0.0  }
 0x509   : > { %v1397_v53 = vcombine.low %v1372_v44, %v1380_v45  ;;  %v1398_v54 = vcombine.high %v1372_v44, %v1380_v45  ;;  %v999_v57 = vcombine.low %v966_v47, %v982_v48  ;;  %v1000_v58 = vcombine.high %v966_v47, %v982_v48 }
 0x50a   : > { %v6035_v59 = vrot.slane %v1381_v50, %v5904_v32  ;;  %v6038_v7 = vrot.slane %v1382_v52, %v5904_v32  ;;  %v991_v28 = vrot.slane %v983_v55, %v5904_v32  ;;  %v998_v60 = vrot.slane %v984_v56, %v5904_v32 }
 0x50b   : > { %v6041_v9 = vrot.slane %v1397_v53, %v5904_v32  ;;  %v6044_v51 = vrot.slane %v1398_v54, %v5904_v32  ;;  %v1007_v61 = vrot.slane %v999_v57, %v5904_v32  ;;  %v1014_v62 = vrot.slane %v1000_v58, %v5904_v32 }
 0x50c   : > { %6776 = vst [vmem:[#allocation49_spill] sm:$0xff] %v6038_v7  ;;  %v1417_v14 = vcombine.low %v991_v28, %v998_v60  ;;  %v3671_v6 = vcombine.high %v991_v28, %v998_v60  ;;  %v6090_v4 = vmov 0.0   ;;  %v6092_v33 = vmov 0.0  }
 0x50d   : > { %v1433_v10 = vcombine.low %v1007_v61, %v1014_v62  ;;  %v3672_v11 = vcombine.high %v1007_v61, %v1014_v62  ;;  %v6094_v36 = vmov 0.0   ;;  %v6096_v37 = vmov 0.0  }
 0x50e   : > { %v1424_v12 = vrot.slane %v1417_v14, %v5897_v25  ;;  %v1432_v13 = vrot.slane %v3671_v6, %v5897_v25  ;;  %v6098_v38 = vmov 0.0   ;;  %v6100_v39 = vmov 0.0  }
 0x50f   : > { %v1440_v15 = vrot.slane %v1433_v10, %v5897_v25  ;;  %v1448_v16 = vrot.slane %v3672_v11, %v5897_v25  ;;  %v6102_v40 = vmov 0.0   ;;  %v6104_v41 = vmov 0.0  }
 0x510   : > { %v1449_v17 = vcombine.low %v1424_v12, %v1432_v13  ;;  %v1450_v18 = vcombine.high %v1424_v12, %v1432_v13  ;;  %v6106_v42 = vmov 0.0   ;;  %v6108_v43 = vmov 0.0  }
 0x511   : > { %v1465_v19 = vcombine.low %v1440_v15, %v1448_v16  ;;  %v1466_v20 = vcombine.high %v1440_v15, %v1448_v16  ;;  %v6110_v44 = vmov 0.0   ;;  %v6112_v45 = vmov 0.0  }
 0x512   : > { %v6063_v21 = vrot.slane %v1449_v17, %v5904_v32  ;;  %v6066_v22 = vrot.slane %v1450_v18, %v5904_v32  ;;  %v6114_v46 = vmov -inf   ;;  %v6116_v47 = vmov -inf  }
 0x513   : > { %v6069_v23 = vrot.slane %v1465_v19, %v5904_v32  ;;  %v6072_v24 = vrot.slane %v1466_v20, %v5904_v32  ;;  %v6118_v49 = vmov -inf   ;;  %v6120_v48 = vmov -inf  }
 0x514   : > { %v6122_v50 = vmov -inf   ;;  %v6124_v52 = vmov -inf   ;;  %v6126_v53 = vmov -inf   ;;  %v6128_v54 = vmov -inf  }
 0x515 LB: >> { %v6777_v7 = vld [vmem:[#allocation49_spill] sm:$0xff]  ;;  %v6778_v63 = vcombine.low %v6035_v59, %v6041_v9  ;;  %v6779_v2 = vcombine.high %v6035_v59, %v6041_v9  ;;  %s3681_s27 = sshll.u32 %s5193_s28, 3  ;;  %v6780_v26 = vcombine.low %v6063_v21, %v6069_v23  ;;  %v6781_v27 = vcombine.high %v6063_v21, %v6069_v23  ;;  %s1779_s28 = sadd.s32 1, %s5193_s28   ;;  %v5097_v3 = vphi %v6082_v3, %v6801_v3   ;;  %s5193_s28 = sphi %s6130_s28, %s1779_s28   ;;  %v5189_v54 = vphi %v6128_v54, %v6824_v54   ;;  %v5185_v53 = vphi %v6126_v53, %v6823_v53   ;;  %v5181_v52 = vphi %v6124_v52, %v6822_v52   ;;  %v5177_v50 = vphi %v6122_v50, %v6821_v50   ;;  %v5173_v48 = vphi %v6120_v48, %v6820_v48   ;;  %v5169_v49 = vphi %v6118_v49, %v6819_v49   ;;  %v5165_v47 = vphi %v6116_v47, %v6818_v47   ;;  %v5161_v46 = vphi %v6114_v46, %v6817_v46   ;;  %v5157_v45 = vphi %v6112_v45, %v6816_v45   ;;  %v5153_v44 = vphi %v6110_v44, %v6815_v44   ;;  %v5149_v43 = vphi %v6108_v43, %v6814_v43   ;;  %v5145_v42 = vphi %v6106_v42, %v6813_v42   ;;  %v5141_v41 = vphi %v6104_v41, %v6812_v41   ;;  %v5137_v40 = vphi %v6102_v40, %v6811_v40   ;;  %v5133_v39 = vphi %v6100_v39, %v6810_v39   ;;  %v5129_v38 = vphi %v6098_v38, %v6809_v38   ;;  %v5125_v37 = vphi %v6096_v37, %v6808_v37   ;;  %v5121_v36 = vphi %v6094_v36, %v6807_v36   ;;  %v5117_v33 = vphi %v6092_v33, %v6806_v33   ;;  %v5113_v4 = vphi %v6090_v4, %v6805_v4   ;;  %v5109_v35 = vphi %v6088_v35, %v6804_v35   ;;  %v5105_v34 = vphi %v6086_v34, %v6803_v34   ;;  %v5101_v31 = vphi %v6084_v31, %v6802_v31  }
 0x516   : >> { %s1805_s12 = scalar_lea.vmem [#allocation4], %s3681_s27  ;;  %v6782_v8 = vcombine.low %v6777_v7, %v6044_v51  ;;  %v6783_v5 = vcombine.high %v6777_v7, %v6044_v51  ;;  %v6784_v29 = vcombine.low %v6066_v22, %v6072_v24  ;;  %v6785_v30 = vcombine.high %v6066_v22, %v6072_v24  ;;  %s1810_s1 = scalar_lea.vmem [#allocation5], %s3681_s27 }
 0x517   : >> { %3788 = vmatprep.mubr.msk.f32.mxu0 %vm1621_vm1, %v6778_v63  ;;  %3793 = vmatprep.mubr.msk.f32.mxu1 %vm1621_vm1, %v6779_v2  ;;  %v1806_v55 = vld [vmem:[%s1805_s12] sm:$0xff]  ;;  %v1807_v56 = vld [vmem:[%s1805_s12 + $0x10] sm:$0xff]  ;;  %vm2151_vm2 = vcmask 64512   ;;  %p6396_p9 = scmp.ge.s32.totalorder %s1779_s28, 2  }
 0x518   : >> { %v1808_v57 = vld [vmem:[%s1805_s12 + $0x20] sm:$0xff]  ;;  %3786 = vmatprep.subr.msk.mxu0 %vm1621_vm1, %v1806_v55  ;;  %3791 = vmatprep.subr.msk.mxu1 %vm1621_vm1, %v1807_v56  ;;  %v1809_v58 = vld [vmem:[%s1805_s12 + $0x30] sm:$0xff]  ;;  %s5219_s24 = smov (%p6396_p9), 32   ;;  %s5220_s14 = smov (%p6396_p9), 16   ;;  %vm2926_vm3 = vcmask (%p6396_p9), 261120   ;;  %vm2929_vm4 = vcmask (%p6396_p9), 392192  }
 0x519   : >> { %3787 = vmatpush3.xpose.msk.msra.mxu0 %vm1621_vm1, %v1806_v55  ;;  %3792 = vmatpush3.xpose.msk.msra.mxu1 %vm1621_vm1, %v1807_v56  ;;  %v1811_v55 = vld [vmem:[%s1810_s1] sm:$0xff]  ;;  %v1812_v56 = vld [vmem:[%s1810_s1 + $0x10] sm:$0xff]  ;;  %s5221_s20 = smov (%p6396_p9), 48  }
 0x51a   : >> { %3796 = vmatprep.subr.msk.mxu0 %vm1621_vm1, %v1808_v57  ;;  %3801 = vmatprep.subr.msk.mxu1 %vm1621_vm1, %v1809_v58 }
 0x51c   : >> { %3789 = vmatmul.mubr.msk.f32.vlgmr.msra.gmra.mrb[0].mxu0 %vm1621_vm1, %v6780_v26  ;;  %3794 = vmatmul.mubr.msk.f32.vlgmr.msra.gmra.mrb[0].mxu1 %vm1621_vm1, %v6781_v27 }
 0x51d   : >> { %3797 = vmatpush3.xpose.msk.msra.mxu0 %vm1621_vm1, %v1808_v57  ;;  %3802 = vmatpush3.xpose.msk.msra.mxu1 %vm1621_vm1, %v1809_v58  ;;  %v1813_v57 = vld [vmem:[%s1810_s1 + $0x20] sm:$0xff]  ;;  %v6266_v58 = vld [vmem:[%s1810_s1 + $0x30] sm:$0xff] }
 0x51e   : >> { %3798 = vmatprep.mubr.msk.f32.mxu0 %vm1621_vm1, %v6782_v8  ;;  %3803 = vmatprep.mubr.msk.f32.mxu1 %vm1621_vm1, %v6783_v5 }
 0x51f   : >> { %3806 = vmatprep.subr.mxu0 %v1811_v55  ;;  %3811 = vmatprep.subr.mxu1 %v1812_v56 }
 0x520   : >> { %3799 = vmatmul.mubr.msk.f32.vlgmr.msra.gmra.mrb[2].mxu0 %vm1621_vm1, %v6784_v29  ;;  %3804 = vmatmul.mubr.msk.f32.vlgmr.msra.gmra.mrb[2].mxu1 %vm1621_vm1, %v6785_v30 }
 0x521   : >> { %3807 = vmatpush3.msra.mxu0 %v1811_v55  ;;  %3812 = vmatpush3.msra.mxu1 %v1812_v56 }
 0x522   : >> { %3816 = vmatprep.subr.mxu0 %v1813_v57  ;;  %3821 = vmatprep.subr.mxu1 %v6266_v58 }
 0x5ef   : >> { %v3790_v28 = vpop.f32.mrb[0].mxu0  ;;  %v3795_v60 = vpop.f32.mrb[0].mxu1 }
 0x5f0   : >> { %v1890_v61 = vpop.f32.mrb[1].mxu0  ;;  %v2155_v62 = vsel %vm2151_vm2, %v3790_v28, -inf  ;;  %v1974_v14 = vpop.f32.mrb[1].mxu1  ;;  %v2161_v10 = vsel %vm2151_vm2, %v3795_v60, -inf }
 0x5f1   : >> { %2156 = vmax.xlane.f32.xlu1 %v2155_v62  ;;  %v2152_v6 = vsel %vm2151_vm2, %v1890_v61, -inf  ;;  %v2158_v12 = vsel %vm2151_vm2, %v1974_v14, -inf }
 0x5f2   : >> { %2153 = vmax.xlane.f32.xlu0 %v2152_v6 }
 0x5f3   : >> { %v6253_v11 = vpop.f32.mrb[2].mxu1  ;;  %v6256_v13 = vpop.f32.mrb[2].mxu0 }
 0x5f4   : >> { %v2058_v15 = vpop.f32.mrb[3].mxu0  ;;  %v2142_v16 = vpop.f32.mrb[3].mxu1  ;;  %v2173_v19 = vsel %vm2151_vm2, %v6253_v11, -inf  ;;  %v2167_v20 = vsel %vm2151_vm2, %v6256_v13, -inf }
 0x5f5   : >> { %2162 = vmax.xlane.f32.xlu1 %v2161_v10  ;;  %v2170_v17 = vsel %vm2151_vm2, %v2142_v16, -inf  ;;  %v2164_v18 = vsel %vm2151_vm2, %v2058_v15, -inf }
 0x5f6   : >> { %2159 = vmax.xlane.f32.xlu0 %v2158_v12 }
 0x5f9   : >> { %2171 = vmax.xlane.f32.xlu1 %v2170_v17 }
 0x5fa   : >> { %2165 = vmax.xlane.f32.xlu0 %v2164_v18 }
 0x5fd   : >> { %2174 = vmax.xlane.f32.xlu1 %v2173_v19 }
 0x5fe   : >> { %2168 = vmax.xlane.f32.xlu0 %v2167_v20 }
 0x67e   : >> { %v2157_v62 = vpop.xlane.xlu1 %2156 }
 0x67f   : >> { %v6270_v6 = vmax.f32 %v5185_v53, %v2157_v62   ;;  %v2154_v10 = vpop.xlane.xlu0 %2153 }
 0x680   : >> { %v6273_v12 = vmax.f32 %v5189_v54, %v2154_v10  }
 0x681   : >> { %v2185_v17 = vsub.f32 %v5185_v53, %v6270_v6  ;;  %v2209_v18 = vsub.f32 %v3790_v28, %v6270_v6 }
 0x682   : >> { %v2184_v19 = vsub.f32 %v5189_v54, %v6273_v12  ;;  %v2208_v20 = vsub.f32 %v1890_v61, %v6273_v12  ;;  %v2163_v55 = vpop.xlane.xlu1 %2162 }
 0x683   : >> { %v2218_v56 = vmul.f32 1.442695, %v2209_v18  ;;  %v6282_v2 = vmax.f32 %v5177_v50, %v2163_v55   ;;  %v2160_v62 = vpop.xlane.xlu0 %2159 }
 0x684   : >> { %v2216_v5 = vmul.f32 1.442695, %v2208_v20  ;;  %v6285_v10 = vmax.f32 %v5181_v52, %v2160_v62  }
 0x685   : >> { %v2187_v8 = vsub.f32 %v5177_v50, %v6282_v2  ;;  %v2211_v28 = vsub.f32 %v3795_v60, %v6282_v2  ;;  %4415 = vpow2.f32 %v2218_v56 }
 0x686   : >> { %v2186_v26 = vsub.f32 %v5181_v52, %v6285_v10  ;;  %v2210_v61 = vsub.f32 %v1974_v14, %v6285_v10  ;;  %v2172_v18 = vpop.xlane.xlu1 %2171  ;;  %4417 = vpow2.f32 %v2216_v5 }
 0x687   : >> { %v2222_v27 = vmul.f32 1.442695, %v2211_v28  ;;  %v6294_v55 = vmax.f32 %v5165_v47, %v2172_v18   ;;  %v2166_v20 = vpop.xlane.xlu0 %2165 }
 0x688   : >> { %v2220_v62 = vmul.f32 1.442695, %v2210_v61  ;;  %v6297_v29 = vmax.f32 %v5173_v48, %v2166_v20  }
 0x689   : >> { %v2190_v60 = vsub.f32 %v5165_v47, %v6294_v55  ;;  %v2214_v56 = vsub.f32 %v2142_v16, %v6294_v55  ;;  %4419 = vpow2.f32 %v2222_v27 }
 0x68a   : >> { %v2188_v14 = vsub.f32 %v5173_v48, %v6297_v29  ;;  %v2212_v28 = vsub.f32 %v2058_v15, %v6297_v29  ;;  %v2175_v30 = vpop.xlane.xlu1 %2174  ;;  %4421 = vpow2.f32 %v2220_v62 }
 0x68b   : >> { %v2228_v18 = vmul.f32 1.442695, %v2214_v56  ;;  %v6306_v63 = vmax.f32 %v5161_v46, %v2175_v30   ;;  %v2169_v5 = vpop.xlane.xlu0 %2168  ;;  %v2204_v53 = vmul.f32 1.442695, %v2190_v60 }
 0x68c   : >> { %v2224_v61 = vmul.f32 1.442695, %v2212_v28  ;;  %v6309_v20 = vmax.f32 %v5169_v49, %v2169_v5  }
 0x68d   : >> { %v2191_v16 = vsub.f32 %v5161_v46, %v6306_v63  ;;  %v2215_v27 = vsub.f32 %v6253_v11, %v6306_v63  ;;  %4423 = vpow2.f32 %v2228_v18 }
 0x68e   : >> { %v2189_v48 = vsub.f32 %v5169_v49, %v6309_v20  ;;  %v2213_v30 = vsub.f32 %v6256_v13, %v6309_v20  ;;  %4425 = vpow2.f32 %v2224_v61 }
 0x68f   : >> { %v2230_v15 = vmul.f32 1.442695, %v2215_v27  ;;  %v4416_v56 = vpop.eup %4415 }
 0x690   : >> { %v2226_v62 = vmul.f32 1.442695, %v2213_v30  ;;  %v2243_v28 = vsel %vm2151_vm2, %v4416_v56, 0.0  ;;  %v4418_v5 = vpop.eup %4417  ;;  %v2202_v54 = vmul.f32 1.442695, %v2189_v48 }
 0x691   : >> { %4427 = vpow2.f32 %v2230_v15  ;;  %2244 = vadd.xlane.f32.xlu1 %v2243_v28  ;;  %3808 = vmatprep.mubr.msk.f32.mxu0 %vm2151_vm2, %v4418_v5  ;;  %v2240_v46 = vsel %vm2151_vm2, %v4418_v5, 0.0  ;;  %v2194_v28 = vmul.f32 1.442695, %v2185_v17  ;;  %v2192_v5 = vmul.f32 1.442695, %v2184_v19 }
 0x692   : >> { %4429 = vpow2.f32 %v2226_v62  ;;  %2241 = vadd.xlane.f32.xlu0 %v2240_v46  ;;  %3809 = vmatmul.mubr.msk.f32.vlgmr.msra.gmra.mrb[4].mxu0 %vm2151_vm2, %v4416_v56  ;;  %v2198_v46 = vmul.f32 1.442695, %v2187_v8 }
 0x693   : >> { %v4420_v11 = vpop.eup %4419  ;;  %3817 = vmatpush3.msra.mxu0 %v1813_v57  ;;  %4431 = vpow2.f32 %v2194_v28 }
 0x694   : >> { %v2249_v49 = vsel %vm2151_vm2, %v4420_v11, 0.0  ;;  %v4422_v13 = vpop.eup %4421  ;;  %4433 = vpow2.f32 %v2192_v5 }
 0x695   : >> { %2250 = vadd.xlane.f32.xlu1 %v2249_v49  ;;  %3813 = vmatprep.mubr.msk.f32.mxu1 %vm2151_vm2, %v4422_v13  ;;  %v2246_v18 = vsel %vm2151_vm2, %v4422_v13, 0.0  ;;  %4435 = vpow2.f32 %v2198_v46  ;;  %v2200_v49 = vmul.f32 1.442695, %v2188_v14  ;;  %v2206_v13 = vmul.f32 1.442695, %v2191_v16 }
 0x696   : >> { %2247 = vadd.xlane.f32.xlu0 %v2246_v18  ;;  %3814 = vmatmul.mubr.msk.f32.vlgmr.msra.gmra.mrb[4].mxu1 %vm2151_vm2, %v4420_v11  ;;  %v2196_v11 = vmul.f32 1.442695, %v2186_v26 }
 0x697   : >> { %v4424_v61 = vpop.eup %4423  ;;  %3822 = vmatpush3.msra.mxu1 %v6266_v58 }
 0x698   : >> { %3823 = vmatprep.mubr.msk.f32.mxu1 %vm2151_vm2, %v4424_v61  ;;  %v4426_v27 = vpop.eup %4425  ;;  %v2258_v62 = vsel %vm2151_vm2, %v4424_v61, 0.0  ;;  %4437 = vpow2.f32 %v2196_v11 }
 0x699   : >> { %3818 = vmatprep.mubr.msk.f32.mxu0 %vm2151_vm2, %v4426_v27  ;;  %v2252_v30 = vsel %vm2151_vm2, %v4426_v27, 0.0  ;;  %4439 = vpow2.f32 %v2200_v49 }
 0x69a   : >> { %2253 = vadd.xlane.f32.xlu0 %v2252_v30  ;;  %4441 = vpow2.f32 %v2204_v53 }
 0x69b   : >> { %v4428_v57 = vpop.eup %4427  ;;  %4443 = vpow2.f32 %v2202_v54 }
 0x69c   : >> { %3824 = vmatmul.mubr.msk.f32.vlgmr.msra.gmra.mrb[6].mxu1 %vm2151_vm2, %v4428_v57  ;;  %v4430_v15 = vpop.eup %4429  ;;  %v2261_v58 = vsel %vm2151_vm2, %v4428_v57, 0.0  ;;  %4445 = vpow2.f32 %v2206_v13 }
 0x69d   : >> { %3819 = vmatmul.mubr.msk.f32.vlgmr.msra.gmra.mrb[6].mxu0 %vm2151_vm2, %v4430_v15  ;;  %v2255_v56 = vsel %vm2151_vm2, %v4430_v15, 0.0  ;;  %v4432_v17 = vpop.eup %4431 }
 0x69e   : >> { %2256 = vadd.xlane.f32.xlu1 %v2255_v56  ;;  %2259 = vadd.xlane.f32.xlu0 %v2258_v62  ;;  %v4434_v19 = vpop.eup %4433  ;;  %v2233_v50 = vmul.f32 %v5153_v44, %v4432_v17  ;;  %v2273_v53 = vmul.f32 %v5121_v36, %v4432_v17 }
 0x69f   : >> { %v4436_v8 = vpop.eup %4435  ;;  %v2232_v52 = vmul.f32 %v5157_v45, %v4434_v19 }
 0x6a0   : >> { %v2235_v47 = vmul.f32 %v5145_v42, %v4436_v8 }
 0x6a2   : >> { %2262 = vadd.xlane.f32.xlu1 %v2261_v58  ;;  %v4438_v14 = vpop.eup %4437 }
 0x6a3   : >> { %v2234_v48 = vmul.f32 %v5149_v43, %v4438_v14  ;;  %v4440_v57 = vpop.eup %4439 }
 0x6a4   : >> { %v4442_v56 = vpop.eup %4441 }
 0x6a5   : >> { %v4444_v62 = vpop.eup %4443  ;;  %v2238_v5 = vmul.f32 %v5133_v39, %v4442_v56 }
 0x6a6   : >> { %v4446_v46 = vpop.eup %4445 }
 0x71e   : >> { %v2245_v18 = vpop.xlane.xlu1 %2244 }
 0x71f   : >> { %v6352_v44 = vadd.f32 %v2245_v18, %v2233_v50   ;;  %v2242_v61 = vpop.xlane.xlu0 %2241 }
 0x720   : >> { %v6355_v45 = vadd.f32 %v2242_v61, %v2232_v52   ;;  %v2275_v52 = vmul.f32 %v5113_v4, %v4436_v8 }
 0x721   : >> { %v6786_v26 = vmov %v6352_v44  ;;  %v2236_v44 = vmul.f32 %v5141_v41, %v4440_v57 }
 0x722   : >> { %v6787_v27 = vmov %v6355_v45  ;;  %v2251_v60 = vpop.xlane.xlu1 %2250  ;;  %v2237_v45 = vmul.f32 %v5137_v40, %v4444_v62 }
 0x723   : >> { %v6358_v42 = vadd.f32 %v2251_v60, %v2235_v47   ;;  %v2248_v16 = vpop.xlane.xlu0 %2247  ;;  %4447 = vrcp.f32 (%p6396_p9), %v6787_v27 }
 0x724   : >> { %v6361_v43 = vadd.f32 %v2248_v16, %v2234_v48  }
 0x725   : >> { %v6788_v30 = vmov %v6358_v42 }
 0x726   : >> { %v6789_v15 = vmov %v6361_v43  ;;  %v2239_v43 = vmul.f32 %v5129_v38, %v4446_v46 }
 0x727   : >> { %v2254_v58 = vpop.xlane.xlu0 %2253  ;;  %4449 = vrcp.f32 (%p6396_p9), %v6789_v15 }
 0x728   : >> { %v6364_v41 = vadd.f32 %v2254_v58, %v2236_v44   ;;  %v2276_v44 = vmul.f32 %v5109_v35, %v4440_v57 }
 0x72a   : >> { %v6790_v28 = vmov %v6364_v41  ;;  %v2272_v41 = vmul.f32 %v5125_v37, %v4434_v19  ;;  %v2278_v19 = vmul.f32 %v5101_v31, %v4442_v56 }
 0x72b   : >> { %v2257_v11 = vpop.xlane.xlu1 %2256  ;;  %v2260_v42 = vpop.xlane.xlu0 %2259  ;;  %4451 = vrcp.f32 (%p6396_p9), %v6790_v28 }
 0x72c   : >> { %v6368_v40 = vadd.f32 %v2257_v11, %v2237_v45   ;;  %v6370_v39 = vadd.f32 %v2260_v42, %v2238_v5   ;;  %v6813_v42 = vmov %v6788_v30  ;;  %v6816_v45 = vmov %v6787_v27 }
 0x72d   : > { %v4448_v59 = vpop.eup (%p6396_p9), %4447 }
 0x72e   : >> { %v6791_v13 = vmov %v6368_v40  ;;  %v6792_v18 = vmov %v6370_v39  ;;  %v2274_v39 = vmul.f32 %v5117_v33, %v4438_v14 }
 0x72f   : >> { %v2263_v49 = vpop.xlane.xlu1 %2262  ;;  %4453 = vrcp.f32 (%p6396_p9), %v6792_v18 }
 0x730   : >> { %v6373_v38 = vadd.f32 %v2263_v49, %v2239_v43   ;;  %v6814_v43 = vmov %v6789_v15  ;;  %v6819_v49 = vmov %v6309_v20  ;;  %v2935_v20 = vld [vmem:[#allocation15 + $0x18] sm:$0xff] (%p6396_p9)  ;;  %4455 = vrcp.f32 (%p6396_p9), %v6786_v26 }
 0x731   : > { %4457 = vrcp.f32 (%p6396_p9), %v6788_v30  ;;  %v4450_v9 = vpop.eup (%p6396_p9), %4449 }
 0x732   : >> { %v6793_v61 = vmov %v6373_v38  ;;  %v2279_v38 = vmul.f32 %v5097_v3, %v4446_v46  ;;  %v6817_v46 = vmov %v6306_v63  ;;  %v2932_v63 = vld [vmem:[#allocation15] sm:$0xff] (%p6396_p9)  ;;  %4459 = vrcp.f32 (%p6396_p9), %v6791_v13 }
 0x733   : > { %4461 = vrcp.f32 (%p6396_p9), %v6793_v61 }
 0x735   : > { %v4452_v21 = vpop.eup (%p6396_p9), %4451 }
 0x739   : > { %v4454_v23 = vpop.eup (%p6396_p9), %4453 }
 0x765   : >> { %v3810_v54 = vpop.f32.mrb[4].mxu0 }
 0x766   : >> { %v6377_v36 = vadd.f32 %v3810_v54, %v2273_v53   ;;  %v2352_v50 = vpop.f32.mrb[5].mxu0  ;;  %v6823_v53 = vmov %v6270_v6  ;;  %v6824_v54 = vmov %v6273_v12 }
 0x767   : >> { %v6379_v37 = vadd.f32 %v2352_v50, %v2272_v41   ;;  %v6812_v41 = vmov %v6790_v28  ;;  %v6821_v50 = vmov %v6282_v2 }
 0x768   : >> { %v6794_v60 = vmov %v6377_v36  ;;  %v2277_v36 = vmul.f32 %v5105_v34, %v4444_v62  ;;  %v2937_v50 = vld [vmem:[#allocation15 + $0x28] sm:$0xff] (%p6396_p9) }
 0x769   : >> { %v6795_v16 = vmov %v6379_v37  ;;  %v3815_v40 = vpop.f32.mrb[4].mxu1 }
 0x76a   : >> { %v6383_v4 = vadd.f32 %v3815_v40, %v2275_v52   ;;  %v2433_v47 = vpop.f32.mrb[5].mxu1  ;;  %v6811_v40 = vmov %v6791_v13  ;;  %v6822_v52 = vmov %v6285_v10  ;;  %v2620_v51 = vmul.f32 (%p6396_p9), %v4448_v59, %v6795_v16 }
 0x76b   : >> { %v6385_v33 = vadd.f32 %v2433_v47, %v2274_v39   ;;  %v6810_v39 = vmov %v6792_v18  ;;  %v6818_v47 = vmov %v6294_v55  ;;  %v2934_v55 = vld [vmem:[#allocation15 + $0x10] sm:$0xff] (%p6396_p9) }
 0x76c   : >> { %v6796_v58 = vmov %v6383_v4  ;;  %v3919_v10 = vpack.c.bf16 (%p6396_p9), %v2935_v20, %v2934_v55 }
 0x76d   : >> { %v6797_v5 = vmov %v6385_v33 }
 0x76e   : >> { %v6806_v33 = vmov %v6797_v5  ;;  %1778 = sbr.rel (!%p6396_p9) target bundleno = 1301 (0x515), region = 207  ;;  %v2622_v22 = vmul.f32 (%p6396_p9), %v4450_v9, %v6797_v5 }
 0x76f   : >> { %v3825_v17 = vpop.f32.mrb[6].mxu1 }
 0x770   : >> { %v6389_v3 = vadd.f32 %v3825_v17, %v2279_v38   ;;  %v2595_v37 = vpop.f32.mrb[7].mxu1  ;;  %v3820_v48 = vpop.f32.mrb[6].mxu0  ;;  %v6809_v38 = vmov %v6793_v61 }
 0x771   : >> { %v2610_v8 = vadd.f32 %v2595_v37, %v2278_v19   ;;  %v6393_v34 = vadd.f32 %v3820_v48, %v2277_v36   ;;  %v2514_v4 = vpop.f32.mrb[7].mxu0  ;;  %v6807_v36 = vmov %v6794_v60  ;;  %v6808_v37 = vmov %v6795_v16 }
 0x772   : >> { %v6798_v11 = vmov %v6389_v3  ;;  %v2608_v7 = vadd.f32 %v2514_v4, %v2276_v44   ;;  %v6805_v4 = vmov %v6796_v58  ;;  %v6815_v44 = vmov %v6786_v26 }
 0x773   : >> { %v6799_v14 = vmov %v6393_v34  ;;  %v6801_v3 = vmov %v6798_v11  ;;  %v6802_v31 = vmov %v2610_v8  ;;  %v6820_v48 = vmov %v6297_v29  ;;  %v2933_v29 = vld [vmem:[#allocation15 + $0x8] sm:$0xff] (%p6396_p9) }
 0x774   : >> { %v6803_v34 = vmov %v6799_v14  ;;  %v6804_v35 = vmov %v2608_v7  ;;  %v3915_v2 = vpack.c.bf16 (%p6396_p9), %v2933_v29, %v2932_v63  ;;  %v2624_v24 = vmul.f32 (%p6396_p9), %v4452_v21, %v2608_v7  ;;  %v4456_v3 = vpop.eup (%p6396_p9), %4455 }
 0x775   : > { %v2626_v31 = vmul.f32 %v4454_v23, %v2610_v8  ;;  %v4458_v34 = vpop.eup %4457  ;;  %v2621_v6 = vmul.f32 %v4456_v3, %v6794_v60  ;;  %v2936_v60 = vld [vmem:[#allocation15 + $0x20] sm:$0xff] }
 0x776   : > { %3916 = vmatprep.subr.bf16.mxu0 %v3915_v2  ;;  %v2628_v35 = vcombine.low %v2620_v51, %v2624_v24  ;;  %v2629_v33 = vcombine.high %v2620_v51, %v2624_v24  ;;  %v4460_v12 = vpop.eup %4459  ;;  %v2623_v56 = vmul.f32 %v4458_v34, %v6796_v58  ;;  %v3923_v5 = vpack.c.bf16 %v2937_v50, %v2936_v60 }
 0x777   : > { %3918 = vmatpush3.bf16.msra.mxu0 %v3915_v2  ;;  %v2644_v26 = vcombine.low %v2622_v22, %v2626_v31  ;;  %v2645_v27 = vcombine.high %v2622_v22, %v2626_v31  ;;  %v4462_v30 = vpop.eup %4461  ;;  %v2625_v62 = vmul.f32 %v4460_v12, %v6799_v14 }
 0x778   : > { %3920 = vmatprep.subr.bf16.mxu0 %v3919_v10  ;;  %v2636_v57 = vrot.slane %v2628_v35, %v5897_v25  ;;  %v2643_v15 = vrot.slane %v2629_v33, %v5897_v25  ;;  %v2627_v45 = vmul.f32 %v4462_v30, %v6798_v11  ;;  %v2939_v30 = vld [vmem:[#allocation15 + $0x38] sm:$0xff] }
 0x779   : > { %v2652_v7 = vrot.slane %v2644_v26, %v5897_v25  ;;  %v2659_v28 = vrot.slane %v2645_v27, %v5897_v25  ;;  %v2696_v46 = vcombine.low %v2621_v6, %v2625_v62  ;;  %v2697_v42 = vcombine.high %v2621_v6, %v2625_v62  ;;  %v2938_v27 = vld [vmem:[#allocation15 + $0x30] sm:$0xff] }
 0x77a   : > { %v2712_v54 = vcombine.low %v2623_v56, %v2627_v45  ;;  %v2713_v41 = vcombine.high %v2623_v56, %v2627_v45 }
 0x77b   : > { %3922 = vmatpush3.bf16.msra.mxu0 %v3919_v10  ;;  %v2660_v13 = vcombine.low %v2636_v57, %v2652_v7  ;;  %v2661_v18 = vcombine.high %v2636_v57, %v2652_v7  ;;  %v2676_v43 = vcombine.low %v2643_v15, %v2659_v28  ;;  %v2677_v49 = vcombine.high %v2643_v15, %v2659_v28 }
 0x77c   : > { %v2704_v61 = vrot.slane %v2696_v46, %v5897_v25  ;;  %v2711_v53 = vrot.slane %v2697_v42, %v5897_v25  ;;  %v2720_v58 = vrot.slane %v2712_v54, %v5897_v25  ;;  %v2727_v47 = vrot.slane %v2713_v41, %v5897_v25  ;;  %3924 = vmatprep.subr.bf16.mxu0 %v3923_v5 }
 0x77d   : > { %v2668_v16 = vrot.slane %v2660_v13, %v5904_v32  ;;  %v2675_v52 = vrot.slane %v2661_v18, %v5904_v32  ;;  %v2684_v40 = vrot.slane %v2676_v43, %v5904_v32  ;;  %v2691_v39 = vrot.slane %v2677_v49, %v5904_v32 }
 0x77e   : > { %v2728_v36 = vcombine.low %v2704_v61, %v2720_v58  ;;  %v2729_v37 = vcombine.high %v2704_v61, %v2720_v58  ;;  %v2744_v48 = vcombine.low %v2711_v53, %v2727_v47  ;;  %v2745_v8 = vcombine.high %v2711_v53, %v2727_v47 }
 0x77f   : > { %v2764_v38 = vcombine.low %v2668_v16, %v2675_v52  ;;  %v3702_v17 = vcombine.high %v2668_v16, %v2675_v52  ;;  %v2780_v19 = vcombine.low %v2684_v40, %v2691_v39  ;;  %v3703_v11 = vcombine.high %v2684_v40, %v2691_v39  ;;  %3926 = vmatpush3.bf16.msra.mxu0 %v3923_v5 }
 0x780   : > { %v2736_v29 = vrot.slane %v2728_v36, %v5904_v32  ;;  %v2743_v55 = vrot.slane %v2729_v37, %v5904_v32  ;;  %v2752_v2 = vrot.slane %v2744_v48, %v5904_v32  ;;  %v2759_v20 = vrot.slane %v2745_v8, %v5904_v32 }
 0x781   : > { %v2771_v44 = vrot.slane %v2764_v38, %v5897_v25  ;;  %v2779_v14 = vrot.slane %v3702_v17, %v5897_v25  ;;  %v2787_v4 = vrot.slane %v2780_v19, %v5897_v25  ;;  %v2795_v63 = vrot.slane %v3703_v11, %v5897_v25  ;;  %v3706_v17 = vld [vmem:[#allocation17] ss:$0 sm:$0xff] }
 0x782   : > { %v2832_v21 = vcombine.low %v2736_v29, %v2743_v55  ;;  %v3704_v22 = vcombine.high %v2736_v29, %v2743_v55  ;;  %v2848_v23 = vcombine.low %v2752_v2, %v2759_v20  ;;  %v3705_v24 = vcombine.high %v2752_v2, %v2759_v20 }
 0x783   : > { %v2797_v10 = vcombine.high %v2771_v44, %v2779_v14  ;;  %v2813_v59 = vcombine.high %v2787_v4, %v2795_v63  ;;  %v2796_v9 = vcombine.low %v2771_v44, %v2779_v14  ;;  %v2812_v51 = vcombine.low %v2787_v4, %v2795_v63 }
 0x784   : > { %v2839_v33 = vrot.slane %v2832_v21, %v5897_v25  ;;  %v2847_v6 = vrot.slane %v3704_v22, %v5897_v25  ;;  %v2855_v12 = vrot.slane %v2848_v23, %v5897_v25  ;;  %v2863_v26 = vrot.slane %v3705_v24, %v5897_v25 }
 0x785   : > { %v2811_v3 = vrot.slane %v2797_v10, %v5904_v32  ;;  %v2827_v31 = vrot.slane %v2813_v59, %v5904_v32  ;;  %v2804_v34 = vrot.slane %v2796_v9, %v5904_v32  ;;  %v2820_v35 = vrot.slane %v2812_v51, %v5904_v32 }
 0x786   : > { %v2865_v62 = vcombine.high %v2839_v33, %v2847_v6  ;;  %v2881_v7 = vcombine.high %v2855_v12, %v2863_v26  ;;  %v2864_v28 = vcombine.low %v2839_v33, %v2847_v6  ;;  %v2880_v45 = vcombine.low %v2855_v12, %v2863_v26 }
 0x787   : > { %v2830_v57 = vcombine.low %v2811_v3, %v2827_v31  ;;  %v2829_v15 = vcombine.high %v2804_v34, %v2820_v35  ;;  %v2828_v56 = vcombine.low %v2804_v34, %v2820_v35  ;;  %v3927_v46 = vpack.c.bf16 %v2939_v30, %v2938_v27  ;;  %v3710_v35 = vld [vmem:[#allocation20] ss:$0 sm:$0xff] }
 0x788   : > { %v2879_v42 = vrot.slane %v2865_v62, %v5904_v32  ;;  %v2895_v13 = vrot.slane %v2881_v7, %v5904_v32  ;;  %v2872_v25 = vrot.slane %v2864_v28, %v5904_v32  ;;  %v2888_v18 = vrot.slane %v2880_v45, %v5904_v32 }
 0x789   : > { %2910 = vrot.lane.b32.xlu1 %v2830_v57, %s5219_s24  ;;  %2902 = vrot.lane.b32.xlu0 %v2829_v15, %s5220_s14  ;;  %v2831_v54 = vcombine.high %v2811_v3, %v2827_v31  ;;  %v3709_v31 = vld [vmem:[#allocation18] ss:$0 sm:$0xff] }
 0x78a   : > { %3928 = vmatprep.subr.bf16.mxu0 %v3927_v46  ;;  %v2898_v43 = vcombine.low %v2879_v42, %v2895_v13  ;;  %v2897_v49 = vcombine.high %v2872_v25, %v2888_v18  ;;  %v2896_v61 = vcombine.low %v2872_v25, %v2888_v18  ;;  %v2899_v53 = vcombine.high %v2879_v42, %v2895_v13 }
 0x78b   : > { %3930 = vmatpush3.bf16.msra.mxu0 %v3927_v46 }
 0x78d   : > { %2912 = vrot.lane.b32.xlu1 %v2898_v43, %s5219_s24  ;;  %2904 = vrot.lane.b32.xlu0 %v2897_v49, %s5220_s14 }
 0x791   : > { %2920 = vrot.lane.b32.xlu1 %v2899_v53, %s5221_s20  ;;  %2918 = vrot.lane.b32.xlu0 %v2831_v54, %s5221_s20 }
 0x7fb   : > { %v2911_v41 = vpop.permute.xlu1 %2910  ;;  %v2903_v60 = vpop.permute.xlu0 %2902 }
 0x7fc   : > { %v2924_v52 = vsel %vm1621_vm1, %v2828_v56, %v2903_v60 }
 0x7fd   : > { %v2927_v47 = vsel %vm2926_vm3, %v2924_v52, %v2911_v41 }
 0x7ff   : > { %v2913_v50 = vpop.permute.xlu1 %2912  ;;  %v2905_v16 = vpop.permute.xlu0 %2904 }
 0x800   : > { %v2925_v32 = vsel %vm1621_vm1, %v2896_v61, %v2905_v16 }
 0x801   : > { %v2928_v40 = vsel %vm2926_vm3, %v2925_v32, %v2913_v50 }
 0x803   : > { %v2921_v39 = vpop.permute.xlu1 %2920  ;;  %v2919_v58 = vpop.permute.xlu0 %2918 }
 0x804   : > { %v2930_v5 = vsel %vm2929_vm4, %v2927_v47, %v2919_v58  ;;  %v2931_v38 = vsel %vm2929_vm4, %v2928_v40, %v2921_v39 }
 0x805   : > { %3842 = vmatprep.mubr.msk.f32.mxu0 %vm706_vm0, %v2930_v5 }
 0x806   : > { %3843 = vmatmul.mubr.msk.f32.vlgmr.msra.gmra.mrb[0].mxu0 %vm706_vm0, %v2931_v38 }
 0x8d9   : > { %v3844_v19 = vpop.f32.mrb[0].mxu0 }
 0x8da   : > { %v3025_v11 = vadd.f32 %v3844_v19, %v3706_v17  ;;  %v3019_v36 = vpop.f32.mrb[1].mxu0 }
 0x8db   : > { %v3020_v37 = vadd.f32 %v3706_v17, %v3019_v36 }
 0x8dc   : > { %v3029_v48 = vadd.f32 %v3025_v11, %v5841_v1 }
 0x8dd   : > { %v3028_v8 = vadd.f32 %v3020_v37, %v5838_v0 }
 0x8de   : > { %3031 = vst.msk [vmem:[#allocation3 + $0x8] sm:$0xff] %vm706_vm0, %v3029_v48  ;;  %v3037_v44 = vsel %vm706_vm0, %v3029_v48, 0.0 }
 0x8df   : > { %3030 = vst.msk [vmem:[#allocation3] sm:$0xff] %vm706_vm0, %v3028_v8  ;;  %3038 = vadd.xlane.f32.xlu1 %v3037_v44  ;;  %v3034_v14 = vsel %vm706_vm0, %v3028_v8, 0.0 }
 0x8e0   : > { %3035 = vadd.xlane.f32.xlu0 %v3034_v14 }
 0x96c   : > { %v3039_v4 = vpop.xlane.xlu1 %3038 }
 0x96d   : > { %v3041_v63 = vmul.f32 0.015625, %v3039_v4  ;;  %v3036_v29 = vpop.xlane.xlu0 %3035 }
 0x96e   : > { %v3040_v55 = vmul.f32 0.015625, %v3036_v29 }
 0x96f   : > { %v3043_v2 = vsub.f32 %v3029_v48, %v3041_v63 }
 0x970   : > { %v3042_v20 = vsub.f32 %v3028_v8, %v3040_v55 }
 0x971   : > { %v3045_v0 = vmul.f32 %v3043_v2, %v3043_v2 }
 0x972   : > { %v3044_v10 = vmul.f32 %v3042_v20, %v3042_v20 }
 0x973   : > { %v3049_v59 = vsel %vm706_vm0, %v3045_v0, 0.0 }
 0x974   : > { %v3046_v1 = vsel %vm706_vm0, %v3044_v10, 0.0 }
 0x975   : > { %3047 = vadd.xlane.f32.xlu0 %v3046_v1 }
 0x979   : > { %3050 = vadd.xlane.f32.xlu0 %v3049_v59 }
 0xa02   : > { %v3048_v9 = vpop.xlane.xlu0 %3047 }
 0xa03   : > { %v3052_v51 = vmul.f32 0.015625, %v3048_v9 }
 0xa05   : > { %v3054_v21 = vadd.f32 1e-05, %v3052_v51 }
 0xa06   : > { %v3051_v22 = vpop.xlane.xlu0 %3050 }
 0xa07   : > { %4463 = vrsqrt.f32 %v3054_v21  ;;  %v3053_v23 = vmul.f32 0.015625, %v3051_v22 }
 0xa09   : > { %v3055_v24 = vadd.f32 1e-05, %v3053_v23 }
 0xa0b   : > { %4465 = vrsqrt.f32 %v3055_v24 }
 0xa11   : > { %v4464_v3 = vpop.eup %4463 }
 0xa12   : > { %v3058_v34 = vmul.f32 %v4464_v3, %v3042_v20 }
 0xa14   : > { %v3066_v33 = vmul.f32 %v3709_v31, %v3058_v34 }
 0xa15   : > { %v4466_v6 = vpop.eup %4465 }
 0xa16   : > { %v3074_v12 = vadd.f32 %v3710_v35, %v3066_v33  ;;  %v3059_v26 = vmul.f32 %v4466_v6, %v3043_v2 }
 0xa18   : > { %3076 = vst.msk [vmem:[#allocation2] sm:$0xff] %vm706_vm0, %v3074_v12  ;;  %v3067_v27 = vmul.f32 %v3709_v31, %v3059_v26 }
 0xa1a   : > { %v3075_v30 = vadd.f32 %v3710_v35, %v3067_v27 }
 0xa1c   : > { %3077 = vst.msk [vmem:[#allocation2 + $0x8] sm:$0xff] %vm706_vm0, %v3075_v30 }
 0xa1d PF: > { %v3080_v57 = vld [vmem:[%s5816_s0] sm:$0xff]  ;;  %v3081_v15 = vld [vmem:[%s5816_s0 + $0x8] sm:$0xff]  ;;  %v3082_v56 = vld [vmem:[%s5816_s0 + $0x10] sm:$0xff]  ;;  %vm3095_vm5 = vcmask 523264   ;;  %s6825_s25 = sld [smem:[#allocation41_spill]] }
 0xa1e   : > { %v3931_v62 = vpack.c.bf16 %v3081_v15, %v3080_v57  ;;  %v3083_v7 = vld [vmem:[%s5816_s0 + $0x18] sm:$0xff]  ;;  %v3084_v45 = vld [vmem:[%s5816_s0 + $0x20] sm:$0xff]  ;;  %v3085_v46 = vld [vmem:[%s5816_s0 + $0x28] sm:$0xff] }
 0xa1f   : > { %v3935_v28 = vpack.c.bf16 %v3083_v7, %v3082_v56  ;;  %v3078_v42 = vld [vmem:[#allocation2] sm:$0xff]  ;;  %v3189_v13 = vld [vmem:[%s5824_s21] sm:$0xff]  ;;  %v3190_v25 = vld [vmem:[%s5824_s21 + $0x8] sm:$0xff]  ;;  %v3939_v61 = vpack.c.bf16 %v3085_v46, %v3084_v45 }
 0xa20   : > { %3932 = vmatprep.subr.bf16.mxu0 %v3931_v62  ;;  %3861 = vmatprep.mubr.msk.f32.mxu0 %vm3095_vm5, %v3078_v42  ;;  %v3947_v18 = vpack.c.bf16 %v3190_v25, %v3189_v13  ;;  %v3191_v43 = vld [vmem:[%s5824_s21 + $0x10] sm:$0xff]  ;;  %v3192_v49 = vld [vmem:[%s5824_s21 + $0x18] sm:$0xff]  ;;  %v3193_v54 = vld [vmem:[%s5824_s21 + $0x20] sm:$0xff] }
 0xa21   : > { %3934 = vmatpush3.bf16.msra.mxu0 %v3931_v62  ;;  %v3951_v53 = vpack.c.bf16 %v3192_v49, %v3191_v43  ;;  %v3194_v41 = vld [vmem:[%s5824_s21 + $0x28] sm:$0xff]  ;;  %v3087_v50 = vld [vmem:[%s5816_s0 + $0x38] sm:$0xff]  ;;  %v3197_v47 = vld [vmem:[%s5824_s21 + $0x40] sm:$0xff] }
 0xa22   : > { %3936 = vmatprep.subr.bf16.mxu0 %v3935_v28  ;;  %v3086_v60 = vld [vmem:[%s5816_s0 + $0x30] sm:$0xff]  ;;  %3948 = vmatprep.subr.bf16.mxu1 %v3947_v18  ;;  %v3955_v16 = vpack.c.bf16 %v3194_v41, %v3193_v54  ;;  %v3196_v39 = vld [vmem:[%s5824_s21 + $0x38] sm:$0xff]  ;;  %v3201_v36 = vld [vmem:[%s5824_s21 + $0x60] sm:$0xff] }
 0xa23   : > { %3950 = vmatpush3.bf16.msra.mxu1 %v3947_v18  ;;  %v3943_v52 = vpack.c.bf16 %v3087_v50, %v3086_v60  ;;  %v3079_v32 = vld [vmem:[#allocation2 + $0x8] sm:$0xff]  ;;  %v3195_v40 = vld [vmem:[%s5824_s21 + $0x30] sm:$0xff]  ;;  %v3198_v5 = vld [vmem:[%s5824_s21 + $0x48] sm:$0xff]  ;;  %p3714_p8 = scmp.ne.s32.totalorder %s6825_s25, 1 }
 0xa24   : > { %3952 = vmatprep.subr.bf16.mxu1 %v3951_v53  ;;  %v3959_v58 = vpack.c.bf16 %v3196_v39, %v3195_v40  ;;  %v3963_v38 = vpack.c.bf16 %v3198_v5, %v3197_v47  ;;  %v3199_v17 = vld [vmem:[%s5824_s21 + $0x50] sm:$0xff]  ;;  %v3200_v19 = vld [vmem:[%s5824_s21 + $0x58] sm:$0xff]  ;;  %v3202_v37 = vld [vmem:[%s5824_s21 + $0x68] sm:$0xff] }
 0xa25   : > { %3938 = vmatpush3.bf16.msra.mxu0 %v3935_v28  ;;  %v3967_v11 = vpack.c.bf16 %v3200_v19, %v3199_v17  ;;  %v3971_v48 = vpack.c.bf16 %v3202_v37, %v3201_v36  ;;  %v3203_v8 = vld [vmem:[%s5824_s21 + $0x70] sm:$0xff]  ;;  %v3204_v44 = vld [vmem:[%s5824_s21 + $0x78] sm:$0xff]  ;;  %v3187_v3 = vld [vmem:[#allocation3] sm:$0xff] }
 0xa26   : > { %3940 = vmatprep.subr.bf16.mxu0 %v3939_v61  ;;  %v3975_v14 = vpack.c.bf16 %v3204_v44, %v3203_v8  ;;  %v3711_v4 = vld [vmem:[%s627_s7] ss:$0 sm:$0xff]  ;;  %v3188_v24 = vld [vmem:[#allocation3 + $0x8] sm:$0xff]  ;;  %v3715_v12 = vld [vmem:[#allocation26] ss:$0 sm:$0xff] (!%p3714_p8) }
 0xa27   : > { %3954 = vmatpush3.bf16.msra.mxu1 %v3951_v53 }
 0xa28   : > { %3956 = vmatprep.subr.bf16.mxu1 %v3955_v16 }
 0xa29   : > { %3942 = vmatpush3.bf16.msra.mxu0 %v3939_v61 }
 0xa2a   : > { %3944 = vmatprep.subr.bf16.mxu0 %v3943_v52 }
 0xa2b   : > { %3958 = vmatpush3.bf16.msra.mxu1 %v3955_v16 }
 0xa2c   : > { %3960 = vmatprep.subr.bf16.mxu1 %v3959_v58 }
 0xa2d   : > { %3946 = vmatpush3.bf16.msra.mxu0 %v3943_v52 }
 0xa2f   : > { %3962 = vmatpush3.bf16.msra.mxu1 %v3959_v58 }
 0xa30   : > { %3862 = vmatmul.mubr.msk.f32.vlgmr.msra.gmra.mrb[0].mxu0 %vm3095_vm5, %v3079_v32  ;;  %3964 = vmatprep.subr.bf16.mxu1 %v3963_v38 }
 0xa33   : > { %3966 = vmatpush3.bf16.msra.mxu1 %v3963_v38 }
 0xa34   : > { %3968 = vmatprep.subr.bf16.mxu1 %v3967_v11 }
 0xa37   : > { %3970 = vmatpush3.bf16.msra.mxu1 %v3967_v11 }
 0xa38   : > { %3972 = vmatprep.subr.bf16.mxu1 %v3971_v48 }
 0xa3b   : > { %3974 = vmatpush3.bf16.msra.mxu1 %v3971_v48 }
 0xa3c   : > { %3976 = vmatprep.subr.bf16.mxu1 %v3975_v14 }
 0xa3f   : > { %3978 = vmatpush3.bf16.msra.mxu1 %v3975_v14 }
 0xb03   : > { %v3863_v63 = vpop.f32.mrb[0].mxu0 }
 0xb04   : > { %v3174_v29 = vadd.f32 %v3863_v63, %v3711_v4  ;;  %v3168_v55 = vpop.f32.mrb[1].mxu0 }
 0xb05   : > { %v3169_v2 = vadd.f32 %v3711_v4, %v3168_v55 }
 0xb06   : > { %v3180_v20 = vmul.f32 0.70710677, %v3174_v29  ;;  %v3178_v21 = vmul.f32 0.5, %v3174_v29 }
 0xb07   : > { %v3179_v10 = vmul.f32 0.70710677, %v3169_v2  ;;  %v3177_v9 = vmul.f32 0.5, %v3169_v2 }
 0xb08   : > { %4467 = verf.f32 %v3180_v20 }
 0xb09   : > { %4469 = verf.f32 %v3179_v10 }
 0xb12   : > { %v4468_v1 = vpop.eup %4467 }
 0xb13   : > { %v4470_v0 = vpop.eup %4469  ;;  %v3184_v59 = vadd.f32 1.0, %v4468_v1 }
 0xb14   : > { %v3183_v51 = vadd.f32 1.0, %v4470_v0 }
 0xb15   : > { %v3186_v23 = vmul.f32 %v3184_v59, %v3178_v21 }
 0xb16   : > { %v3185_v22 = vmul.f32 %v3183_v51, %v3177_v9 }
 0xb18   : > { %3896 = vmatprep.mubr.f32.mxu1 %v3185_v22 }
 0xb19   : > { %3897 = vmatmul.mubr.f32.vlgmr.msra.gmra.mrb[0].mxu1 %v3186_v23 }
 0xbea   : > { %3287 = sbr.rel (%p3714_p8) target bundleno = 3067 (0xbfb), region = 139 }
 0xbec   : > { %v3898_v31 = vpop.f32.mrb[0].mxu1 }
 0xbed   : > { %v3281_v34 = vadd.f32 %v3898_v31, %v3188_v24  ;;  %v3271_v35 = vpop.f32.mrb[1].mxu1 }
 0xbee   : > { %v3280_v33 = vadd.f32 %v3271_v35, %v3187_v3 }
 0xbef   : > { %3283 = vst.msk [vmem:[#allocation3 + $0x8] sm:$0xff] %vm3095_vm5, %v3281_v34 }
 0xbf0   : > { %3282 = vst.msk [vmem:[#allocation3] sm:$0xff] %vm3095_vm5, %v3280_v33 }
 0xbf6   : > { %v3289_v26 = vld [vmem:[#allocation3 + $0x8] sm:$0xff] }
 0xbf7   : > { %v3288_v6 = vld [vmem:[#allocation3] sm:$0xff]  ;;  %v3298_v30 = vadd.f32 %v3715_v12, %v3289_v26 }
 0xbf8   : > { %v3297_v27 = vadd.f32 %v3715_v12, %v3288_v6 }
 0xbf9   : > { %3300 = vst.msk [vmem:[%s5834_s22 + $0x8] sm:$0xff] %vm3095_vm5, %v3298_v30 }
 0xbfa   : > { %3299 = vst.msk [vmem:[%s5834_s22] sm:$0xff] %vm3095_vm5, %v3297_v27 }
 0xbfb PF: > { %s6826_s15 = sld [smem:[#allocation42_spill]]  ;;  %s6827_s2 = sld [smem:[#allocation63_spill]] }
 0xbfc   : > { %s3315_s17 = sshll.u32 %s5834_s22, 4  ;;  %s3302_s21 = scalar_lea.sflag [#allocation8], %s5785_s5  ;;  %s6576_s17 = int_to_ptr.vmem [resolvable:$true] %s3315_s17 }
 0xbfd   : > { %s4843_s30 = scalar_lea.vmem %s6576_s17, 256  ;;  %p6828_p11 = scmp.ne.s32.totalorder %s6746_s11, 0 }
 0xbfe   : > { %p4844_p2 = scmp.ne.s32.totalorder %s6576_s17, %s4843_s30  ;;  %s5222_s19 = smov [#allocation27]  }
 0xbff   : > { %s4847_s8 = sshll.u32 %s5222_s19, 4  ;;  %s4848_s8 = int_to_ptr.vmem [resolvable:$false] %s4847_s8 }
 0xc00   : > { %p4845_p1 = pnand %p4844_p2, %p6828_p11  ;;  %s4849_s23 = scalar_lea.vmem %s4848_s8, 512 }
 0xc01   : > { %s3723_s4 = sshll.u32 %s6826_s15, 8  ;;  %p4850_p10 = scmp.lt.s32.totalorder %s6576_s17, %s4848_s8 }
 0xc02   : > { %s6573_s7 = scalar_lea.hbm %s6827_s2, %s3723_s4  ;;  %p4846_p3 = pneg %p4845_p1 }
 0xc03   : > { %p4851_p13 = scmp.lt.s32.totalorder %s4849_s23, %s4843_s30 }
 0xc05   : > { %p4852_p5 = por %p4851_p13, %p4850_p10 }
 0xc07   : > { %p4853_p0 = pnand %p4852_p5, %p4846_p3 }
 0xc09   : > { %4856 = shalt.err (!%p4853_p0)
}
 0xc0a   : > { %s4857_s22 = scalar_lea.hbm %s6573_s7, 256  ;;  %s4861_s27 = scalar_lea.hbm %s6827_s2, 512 }
 0xc0b   : > { %p4858_p12 = scmp.ne.s32.totalorder %s6573_s7, %s4857_s22  ;;  %p4862_p6 = scmp.lt.u32.totalorder %s6573_s7, %s6827_s2 }
 0xc0c   : > { %p4863_p9 = scmp.lt.u32.totalorder %s4861_s27, %s4857_s22  ;;  %p4865_p2 = scmp.lt.u32.totalorder %s4857_s22, %s6573_s7 }
 0xc0d   : > { %p4859_p4 = pnand %p4858_p12, %p6828_p11 }
 0xc0e   : > { %p4864_p8 = por %p4863_p9, %p4862_p6 }
 0xc0f   : > { %p4860_p7 = pneg %p4859_p4 }
 0xc10   : > { %p4866_p1 = por %p4865_p2, %p4864_p8 }
 0xc12   : > { %p4867_p3 = pnand %p4866_p1, %p4860_p7 }
 0xc14   : > { %4870 = shalt.err (!%p4867_p3)
}
 0xc15   : > { %s5223_s10 = smov 128   ;;  %s5224_s24 = smov 8  }
 0xc16   : > { %4031 = dma.vmem_to_hbm [thread:$0]  (%p6828_p11), %s6576_s17, 256, %s6573_s7, %s3302_s21, %s5223_s10, %s5223_s10, %s5224_s24  }
 0xc17 PF: > { %s6829_s14 = sld [smem:[#allocation38_spill]]  ;;  %p4097_p10 = scmp.ge.s32.totalorder %s5093_s18, 2 }
 0xc18   : > { %p6830_p13 = scmp.ne.s32.totalorder %s6748_s3, 0 }
 0xc1a   : > { %p4075_p5 = pnand %p4097_p10, %p6830_p13 }
 0xc1d   : > { %s3330_s20 = sand.u32 1, %s6829_s14  }
 0xc1e   : > { %s3331_s25 = scalar_lea.sflag [#allocation8], %s3330_s20 }
 0xc1f   : > { %5048 = dma.done.wait (!%p4075_p5), %s3331_s25, 256  }
 0xc20   : > { %5050 = vsyncadd (!%p4075_p5), %s3331_s25, 4294967040  ;;  %s39_s18 = sadd.s32 1, %s5093_s18   ;;  %s6831_s15 = sld [smem:[#allocation37_spill]] }
 0xc21   : > { %p36_p0 = scmp.ge.s32.totalorder %s39_s18, 6   ;;  %s6832_s27 = sld [smem:[#allocation47_spill]] }
 0xc22   : > { %s6833_s28 = sld [smem:[#allocation39_spill]]  ;;  %s6834_s29 = sld [smem:[#allocation40_spill]] }
 0xc23   : > { %s6835_s30 = sld [smem:[#allocation48_spill]]  ;;  %s6836_s11 = sld [smem:[#allocation43_spill]] }
 0xc24   : > { %s6837_s5 = sld [smem:[#allocation45_spill]]  ;;  %s6838_s17 = sld [smem:[#allocation46_spill]] }
 0xc25   : > { %s6839_s25 = smov %s5057_s26  ;;  %s6841_s14 = smov %s5085_s16 }
 0xc26   : > { %s6840_s26 = smov %s6831_s15  ;;  %38 = sbr.rel (!%p36_p0) target bundleno = 32 (0x20), region = 218 }
 0xc29   : > { %s6842_s15 = smov %s6836_s11 }
 0xc2a   : > { %s6843_s16 = smov %s6837_s5 }
 0xc2d   :  { %3336 = vsyncpa [#allocation7], 1 }
 0xc2e   :  { %3338 = vsyncpa [#allocation7 + $0x1], 1 }
 0xc2f   :  { %3339 = vsyncpa [#allocation10], 1 }
 0xc30   :  { %3340 = vsyncpa [#allocation13], 1 }
 0xc31   :  { %3341 = vsyncpa [#allocation16], 1 }
 0xc32   :  { %3342 = vsyncpa [#allocation19], 1 }
 0xc33   :  { %3343 = vsyncpa [#allocation22], 1 }
 0xc34   :  { %3345 = vsyncpa [#allocation22 + $0x1], 1 }
 0xc35   :  { %3346 = vsyncpa [#allocation25], 1 }
 0xc36   :  { %3348 = vsyncpa [#allocation25 + $0x1], 1 }
 0xc37   :  { %3349 = vsyncpa [#allocation8], 1 }
 0xc38   :  { %3351 = vsyncpa [#allocation8 + $0x1], 1 }

</bundles_post_ra>
